<compile_context>
chip_gen: v7x
topology: tpu7x:2x2x1
jax: 0.10.0
libtpu: 0.0.40
codegen_flags: <defaults>
</compile_context>

<pallas_src>
import jax
import jax.numpy as jnp
from jax import lax
from jax.experimental import pallas as pl
from jax.experimental.pallas import tpu as pltpu

INPUT = 128
HIDDEN = 64
GPAD = 128          # each gate padded to a full 128-lane block (r/z/n at offsets 0/128/256)
FC1 = 256
NCLASS = 2
LOGIT_PAD = 128     # pad fc2 output to a full lane register (dense store)


def gru_classifier_kernel(x_ref,          # (T, B, 128)   time-major input
                          wi_ref,         # (128, 384)    [W_ir|0 | W_iz|0 | W_in|0]
                          wh_ref,         # (64, 384)     [W_hr|0 | W_hz|0 | W_hn|0]
                          bi_ref,         # (1, 384)      [b_ir+b_hr|0 | b_iz+b_hz|0 | b_in|0]
                          bhn_ref,        # (1, 64)       b_hn (n-gate needs r*(h@W_hn + b_hn))
                          w1_ref, b1_ref,  # (64, 256), (1, 256)
                          w2_ref, b2_ref,  # (256, 128) zero-padded, (1, 128) zero-padded
                          out_ref,        # (B, 128)      padded log-probs (cols 0..1 are real)
                          gi_ref):        # VMEM scratch (T*B, 384)
    T, B, _ = x_ref.shape

    # ---- Hoisted input projection: one big matmul, off the recurrence critical path. ----
    x2d = x_ref[...].reshape(T * B, INPUT)                       # free relayout when B % 8 == 0
    gi_ref[...] = (jnp.dot(x2d, wi_ref[...], preferred_element_type=jnp.float32)
                   + bi_ref[...])

    # Small hoisted broadcast (JAX does not CSE broadcast_in_dim inside the unrolled loop).
    bhn = jnp.broadcast_to(bhn_ref[...], (B, HIDDEN))

    def step(t, h):
        start = pl.multiple_of(t * B, B)
        gi = gi_ref[pl.ds(start, B), :]                          # (B, 384) VMEM load
        # Only matmul left on the serial path; W_h read in-loop (not pinned across the unroll).
        gh = jnp.dot(h, wh_ref[...], preferred_element_type=jnp.float32)   # (B, 384)
        # r/z fused into one sigmoid over the lane-aligned [r-block | z-block] region.
        rz = jax.nn.sigmoid(gi[:, :2 * GPAD] + gh[:, :2 * GPAD])
        r = rz[:, :HIDDEN]                                       # lanes 0..63 of block 0
        z = rz[:, GPAD:GPAD + HIDDEN]                            # lanes 0..63 of block 1
        n = jnp.tanh(gi[:, 2 * GPAD:2 * GPAD + HIDDEN]
                     + r * (gh[:, 2 * GPAD:2 * GPAD + HIDDEN] + bhn))
        return n + z * (h - n)                                   # == (1-z)*n + z*h

    h0 = jnp.zeros((B, HIDDEN), jnp.float32)
    h = lax.fori_loop(0, T, step, h0, unroll=True if T <= 16 else 4)

    # ---- Classifier head (dropout2 is identity at inference). ----
    y1 = jnp.maximum(
        jnp.dot(h, w1_ref[...], preferred_element_type=jnp.float32) + b1_ref[...], 0.0)
    logits_pad = jnp.dot(y1, w2_ref[...], preferred_element_type=jnp.float32) + b2_ref[...]
    logits = logits_pad[:, :NCLASS]
    # stable log_softmax over dim=1 (computed on the 2 real logits only)
    m = jnp.max(logits, axis=1, keepdims=True)
    lse = m + jnp.log(jnp.sum(jnp.exp(logits - m), axis=1, keepdims=True))
    # Lane-dense (B,128) store; padded lanes hold garbage and are sliced away in the wrapper.
    out_ref[...] = logits_pad - lse


def _const_index_map(ndim):
    def im(i):
        return (0,) * ndim
    return im


def _pad_gate(w):
    """(k, 64) -> (k, 128): place the gate in lanes 0..63, zeros in 64..127."""
    k = w.shape[0]
    return jnp.concatenate([w, jnp.zeros((k, GPAD - HIDDEN), jnp.float32)], axis=1)


@jax.jit
def graph_rnn_classifier(x, params):
    B, T, _ = x.shape

    # Wrapper-side (XLA) weight prep: fuse the three gates at 128-lane stride, pre-sum the r/z
    # biases, pad fc2 to 128 output lanes (padding is zero -> real logits unaffected).
    w_i = jnp.concatenate([_pad_gate(params["w_ir"]),
                           _pad_gate(params["w_iz"]),
                           _pad_gate(params["w_in"])], axis=1)                  # (128, 384)
    w_h = jnp.concatenate([_pad_gate(params["w_hr"]),
                           _pad_gate(params["w_hz"]),
                           _pad_gate(params["w_hn"])], axis=1)                  # (64, 384)
    b_i = jnp.concatenate([_pad_gate(params["b_ir"] + params["b_hr"]),
                           _pad_gate(params["b_iz"] + params["b_hz"]),
                           _pad_gate(params["b_in"])], axis=1)                  # (1, 384)
    b_hn = params["b_hn"]                                                       # (1, 64)
    w2_pad = jnp.zeros((FC1, LOGIT_PAD), jnp.float32).at[:, :NCLASS].set(params["w2"])
    b2_pad = jnp.zeros((1, LOGIT_PAD), jnp.float32).at[:, :NCLASS].set(params["b2"])

    # Time-major layout so rows t*B..t*B+B-1 of the hoisted input projection belong to timestep t.
    x_tm = jnp.transpose(x, (1, 0, 2))                                          # (T, B, 128)

    operands = (x_tm, w_i, w_h, b_i, b_hn, params["w1"], params["b1"], w2_pad, b2_pad)
    in_specs = [pl.BlockSpec(op.shape, _const_index_map(op.ndim)) for op in operands]

    out_pad = pl.pallas_call(
        gru_classifier_kernel,
        out_shape=jax.ShapeDtypeStruct((B, LOGIT_PAD), jnp.float32),
        grid_spec=pltpu.PrefetchScalarGridSpec(
            num_scalar_prefetch=0,
            grid=(1,),
            in_specs=in_specs,
            out_specs=pl.BlockSpec((B, LOGIT_PAD), lambda i: (0, 0)),
            scratch_shapes=[pltpu.VMEM((T * B, 3 * GPAD), jnp.float32)],
        ),
        compiler_params=pltpu.CompilerParams(
            dimension_semantics=("arbitrary",)),
    )(*operands)
    return out_pad[:, :NCLASS]


def init_params(key):
    """Deterministic init matching PyTorch GRU/Linear shapes (U(-1/sqrt(fan), 1/sqrt(fan)))."""
    ks = jax.random.split(key, 8)
    kgru = 1.0 / jnp.sqrt(HIDDEN)
    w_ih = jax.random.uniform(ks[0], (3 * HIDDEN, INPUT), jnp.float32, -kgru, kgru)
    w_hh = jax.random.uniform(ks[1], (3 * HIDDEN, HIDDEN), jnp.float32, -kgru, kgru)
    b_ih = jax.random.uniform(ks[2], (3 * HIDDEN,), jnp.float32, -kgru, kgru)
    b_hh = jax.random.uniform(ks[3], (3 * HIDDEN,), jnp.float32, -kgru, kgru)

    k1 = 1.0 / jnp.sqrt(HIDDEN)
    fc1_w = jax.random.uniform(ks[4], (FC1, HIDDEN), jnp.float32, -k1, k1)
    fc1_b = jax.random.uniform(ks[5], (FC1,), jnp.float32, -k1, k1)
    k2 = 1.0 / jnp.sqrt(FC1)
    fc2_w = jax.random.uniform(ks[6], (NCLASS, FC1), jnp.float32, -k2, k2)
    fc2_b = jax.random.uniform(ks[7], (NCLASS,), jnp.float32, -k2, k2)

    def chunk(a, i):  # gate order r, z, n
        return a[i * HIDDEN:(i + 1) * HIDDEN]

    params = {
        "w_ir": chunk(w_ih, 0).T, "w_iz": chunk(w_ih, 1).T, "w_in": chunk(w_ih, 2).T,
        "w_hr": chunk(w_hh, 0).T, "w_hz": chunk(w_hh, 1).T, "w_hn": chunk(w_hh, 2).T,
        "b_ir": chunk(b_ih, 0).reshape(1, HIDDEN),
        "b_iz": chunk(b_ih, 1).reshape(1, HIDDEN),
        "b_in": chunk(b_ih, 2).reshape(1, HIDDEN),
        "b_hr": chunk(b_hh, 0).reshape(1, HIDDEN),
        "b_hz": chunk(b_hh, 1).reshape(1, HIDDEN),
        "b_hn": chunk(b_hh, 2).reshape(1, HIDDEN),
        "w1": fc1_w.T, "b1": fc1_b.reshape(1, FC1),
        "w2": fc2_w.T, "b2": fc2_b.reshape(1, NCLASS),
    }
    return params


def reference(x, p):
    """Pure-JAX reference mirroring the PyTorch forward (eval mode)."""
    B, T, _ = x.shape
    h = jnp.zeros((B, HIDDEN), jnp.float32)
    for t in range(T):
        xt = x[:, t, :]
        r = jax.nn.sigmoid(xt @ p["w_ir"] + p["b_ir"] + h @ p["w_hr"] + p["b_hr"])
        z = jax.nn.sigmoid(xt @ p["w_iz"] + p["b_iz"] + h @ p["w_hz"] + p["b_hz"])
        n = jnp.tanh(xt @ p["w_in"] + p["b_in"] + r * (h @ p["w_hn"] + p["b_hn"]))
        h = (1.0 - z) * n + z * h
    y1 = jnp.maximum(h @ p["w1"] + p["b1"], 0.0)
    logits = y1 @ p["w2"] + p["b2"]
    return jax.nn.log_softmax(logits, axis=1)


if __name__ == "__main__":
    key = jax.random.PRNGKey(0)
    kx, kp = jax.random.split(key)

    B, T = 8, 8
    x = jax.random.normal(kx, (B, T, INPUT), jnp.float32)
    params = init_params(kp)

    out = graph_rnn_classifier(x, params)
    out = jax.block_until_ready(out)

    ref = reference(x, params)
    assert out.shape == (B, NCLASS)
    assert jnp.allclose(out, ref, atol=1e-4, rtol=1e-4), (out, ref)
    print("KERNEL_OK")
</pallas_src>

<mosaic_0001>
module attributes {stable_mosaic.version = 11 : i64} {
  func.func @gru_classifier_kernel(%arg0: i32, %arg1: memref<8x8x128xf32, #tpu.memory_space<vmem>>, %arg2: memref<128x384xf32, #tpu.memory_space<vmem>>, %arg3: memref<64x384xf32, #tpu.memory_space<vmem>>, %arg4: memref<1x384xf32, #tpu.memory_space<vmem>>, %arg5: memref<1x64xf32, #tpu.memory_space<vmem>>, %arg6: memref<64x256xf32, #tpu.memory_space<vmem>>, %arg7: memref<1x256xf32, #tpu.memory_space<vmem>>, %arg8: memref<256x128xf32, #tpu.memory_space<vmem>>, %arg9: memref<1x128xf32, #tpu.memory_space<vmem>>, %arg10: memref<8x128xf32, #tpu.memory_space<vmem>>, %arg11: memref<64x384xf32, #tpu.memory_space<vmem>>) attributes {dimension_semantics = [#tpu.dimension_semantics<arbitrary>], iteration_bounds = array<i64: 1>, scalar_prefetch = 0 : i64, scratch_operands = 1 : i64, tpu.core_type = #tpu.core_type<tc>, window_params = [{pipeline_mode = #tpu.pipeline_mode<synchronous>, transform_indices = @transform_0, window_bounds = array<i64: 8, 8, 128>}, {pipeline_mode = #tpu.pipeline_mode<synchronous>, transform_indices = @transform_1, window_bounds = array<i64: 128, 384>}, {pipeline_mode = #tpu.pipeline_mode<synchronous>, transform_indices = @transform_2, window_bounds = array<i64: 64, 384>}, {pipeline_mode = #tpu.pipeline_mode<synchronous>, transform_indices = @transform_3, window_bounds = array<i64: 1, 384>}, {pipeline_mode = #tpu.pipeline_mode<synchronous>, transform_indices = @transform_4, window_bounds = array<i64: 1, 64>}, {pipeline_mode = #tpu.pipeline_mode<synchronous>, transform_indices = @transform_5, window_bounds = array<i64: 64, 256>}, {pipeline_mode = #tpu.pipeline_mode<synchronous>, transform_indices = @transform_6, window_bounds = array<i64: 1, 256>}, {pipeline_mode = #tpu.pipeline_mode<synchronous>, transform_indices = @transform_7, window_bounds = array<i64: 256, 128>}, {pipeline_mode = #tpu.pipeline_mode<synchronous>, transform_indices = @transform_8, window_bounds = array<i64: 1, 128>}, {pipeline_mode = #tpu.pipeline_mode<synchronous>, transform_indices = @transform_9, window_bounds = array<i64: 8, 128>}]} {
    %c0 = arith.constant 0 : index
    %c0_0 = arith.constant 0 : index
    %c0_1 = arith.constant 0 : index
    %0 = vector.load %arg1[%c0, %c0_0, %c0_1] : memref<8x8x128xf32, #tpu.memory_space<vmem>>, vector<8x8x128xf32>
    %1 = vector.shape_cast %0 : vector<8x8x128xf32> to vector<64x128xf32>
    %c0_2 = arith.constant 0 : index
    %c0_3 = arith.constant 0 : index
    %2 = vector.load %arg2[%c0_2, %c0_3] : memref<128x384xf32, #tpu.memory_space<vmem>>, vector<128x384xf32>
    %cst = arith.constant dense<0.000000e+00> : vector<64x384xf32>
    %3 = tpu.matmul %1, %2, %cst {dimension_numbers = #tpu.dot_dimension_numbers<[1], [0], [0], [1], [0, 0, 1, 1], [], []>} : vector<64x128xf32>, vector<128x384xf32>, vector<64x384xf32> -> vector<64x384xf32>
    %c0_4 = arith.constant 0 : index
    %c0_5 = arith.constant 0 : index
    %4 = vector.load %arg4[%c0_4, %c0_5] : memref<1x384xf32, #tpu.memory_space<vmem>>, vector<1x384xf32>
    %5 = vector.broadcast %4 : vector<1x384xf32> to vector<64x384xf32>
    %6 = arith.addf %3, %5 : vector<64x384xf32>
    %c0_6 = arith.constant 0 : index
    %c0_7 = arith.constant 0 : index
    %7 = vector.load %arg11[%c0_6, %c0_7] : memref<64x384xf32, #tpu.memory_space<vmem>>, vector<64x384xf32>
    tpu.vector_store %arg11[%c0_6, %c0_7], %6 {strides = array<i32>} : memref<64x384xf32, #tpu.memory_space<vmem>>, vector<64x384xf32>,
    %c0_8 = arith.constant 0 : index
    %c0_9 = arith.constant 0 : index
    %8 = vector.load %arg5[%c0_8, %c0_9] : memref<1x64xf32, #tpu.memory_space<vmem>>, vector<1x64xf32>
    %9 = vector.shape_cast %8 : vector<1x64xf32> to vector<1x64xf32>
    %10 = vector.broadcast %9 : vector<1x64xf32> to vector<8x64xf32>
    %cst_10 = arith.constant 0.000000e+00 : f32
    %11 = vector.broadcast %cst_10 : f32 to vector<8x64xf32>
    %c0_i32 = arith.constant 0 : i32
    %c8_i32 = arith.constant 8 : i32
    %12 = arith.muli %c0_i32, %c8_i32 : i32
    %13 = tpu.assume_multiple %12, 8 : i32
    %14 = arith.index_cast %13 : i32 to index
    %c0_11 = arith.constant 0 : index
    %15 = vector.load %arg11[%14, %c0_11] : memref<64x384xf32, #tpu.memory_space<vmem>>, vector<8x384xf32>
    %c0_12 = arith.constant 0 : index
    %c0_13 = arith.constant 0 : index
    %16 = vector.load %arg3[%c0_12, %c0_13] : memref<64x384xf32, #tpu.memory_space<vmem>>, vector<64x384xf32>
    %cst_14 = arith.constant dense<0.000000e+00> : vector<8x384xf32>
    %17 = tpu.matmul %11, %16, %cst_14 {dimension_numbers = #tpu.dot_dimension_numbers<[1], [0], [0], [1], [0, 0, 1, 1], [], []>} : vector<8x64xf32>, vector<64x384xf32>, vector<8x384xf32> -> vector<8x384xf32>
    %18 = vector.extract_strided_slice %15 {offsets = [0, 0], sizes = [8, 256], strides = [1, 1]} : vector<8x384xf32> to vector<8x256xf32>
    %19 = vector.extract_strided_slice %17 {offsets = [0, 0], sizes = [8, 256], strides = [1, 1]} : vector<8x384xf32> to vector<8x256xf32>
    %20 = arith.addf %18, %19 : vector<8x256xf32>
    %21 = arith.negf %20 : vector<8x256xf32>
    %22 = math.exp %21 : vector<8x256xf32>
    %cst_15 = arith.constant 1.000000e+00 : f32
    %23 = vector.broadcast %cst_15 : f32 to vector<8x256xf32>
    %24 = arith.addf %23, %22 : vector<8x256xf32>
    %25 = arith.divf %23, %24 : vector<8x256xf32>
    %26 = vector.extract_strided_slice %25 {offsets = [0, 0], sizes = [8, 64], strides = [1, 1]} : vector<8x256xf32> to vector<8x64xf32>
    %27 = vector.extract_strided_slice %25 {offsets = [0, 128], sizes = [8, 64], strides = [1, 1]} : vector<8x256xf32> to vector<8x64xf32>
    %28 = vector.extract_strided_slice %15 {offsets = [0, 256], sizes = [8, 64], strides = [1, 1]} : vector<8x384xf32> to vector<8x64xf32>
    %29 = vector.extract_strided_slice %17 {offsets = [0, 256], sizes = [8, 64], strides = [1, 1]} : vector<8x384xf32> to vector<8x64xf32>
    %30 = arith.addf %29, %10 : vector<8x64xf32>
    %31 = arith.mulf %26, %30 : vector<8x64xf32>
    %32 = arith.addf %28, %31 : vector<8x64xf32>
    %33 = math.tanh %32 : vector<8x64xf32>
    %34 = arith.subf %11, %33 : vector<8x64xf32>
    %35 = arith.mulf %27, %34 : vector<8x64xf32>
    %36 = arith.addf %33, %35 : vector<8x64xf32>
    %c1_i32 = arith.constant 1 : i32
    %c8_i32_16 = arith.constant 8 : i32
    %37 = arith.muli %c1_i32, %c8_i32_16 : i32
    %38 = tpu.assume_multiple %37, 8 : i32
    %39 = arith.index_cast %38 : i32 to index
    %c0_17 = arith.constant 0 : index
    %40 = vector.load %arg11[%39, %c0_17] : memref<64x384xf32, #tpu.memory_space<vmem>>, vector<8x384xf32>
    %c0_18 = arith.constant 0 : index
    %c0_19 = arith.constant 0 : index
    %41 = vector.load %arg3[%c0_18, %c0_19] : memref<64x384xf32, #tpu.memory_space<vmem>>, vector<64x384xf32>
    %cst_20 = arith.constant dense<0.000000e+00> : vector<8x384xf32>
    %42 = tpu.matmul %36, %41, %cst_20 {dimension_numbers = #tpu.dot_dimension_numbers<[1], [0], [0], [1], [0, 0, 1, 1], [], []>} : vector<8x64xf32>, vector<64x384xf32>, vector<8x384xf32> -> vector<8x384xf32>
    %43 = vector.extract_strided_slice %40 {offsets = [0, 0], sizes = [8, 256], strides = [1, 1]} : vector<8x384xf32> to vector<8x256xf32>
    %44 = vector.extract_strided_slice %42 {offsets = [0, 0], sizes = [8, 256], strides = [1, 1]} : vector<8x384xf32> to vector<8x256xf32>
    %45 = arith.addf %43, %44 : vector<8x256xf32>
    %46 = arith.negf %45 : vector<8x256xf32>
    %47 = math.exp %46 : vector<8x256xf32>
    %cst_21 = arith.constant 1.000000e+00 : f32
    %48 = vector.broadcast %cst_21 : f32 to vector<8x256xf32>
    %49 = arith.addf %48, %47 : vector<8x256xf32>
    %50 = arith.divf %48, %49 : vector<8x256xf32>
    %51 = vector.extract_strided_slice %50 {offsets = [0, 0], sizes = [8, 64], strides = [1, 1]} : vector<8x256xf32> to vector<8x64xf32>
    %52 = vector.extract_strided_slice %50 {offsets = [0, 128], sizes = [8, 64], strides = [1, 1]} : vector<8x256xf32> to vector<8x64xf32>
    %53 = vector.extract_strided_slice %40 {offsets = [0, 256], sizes = [8, 64], strides = [1, 1]} : vector<8x384xf32> to vector<8x64xf32>
    %54 = vector.extract_strided_slice %42 {offsets = [0, 256], sizes = [8, 64], strides = [1, 1]} : vector<8x384xf32> to vector<8x64xf32>
    %55 = arith.addf %54, %10 : vector<8x64xf32>
    %56 = arith.mulf %51, %55 : vector<8x64xf32>
    %57 = arith.addf %53, %56 : vector<8x64xf32>
    %58 = math.tanh %57 : vector<8x64xf32>
    %59 = arith.subf %36, %58 : vector<8x64xf32>
    %60 = arith.mulf %52, %59 : vector<8x64xf32>
    %61 = arith.addf %58, %60 : vector<8x64xf32>
    %c2_i32 = arith.constant 2 : i32
    %c8_i32_22 = arith.constant 8 : i32
    %62 = arith.muli %c2_i32, %c8_i32_22 : i32
    %63 = tpu.assume_multiple %62, 8 : i32
    %64 = arith.index_cast %63 : i32 to index
    %c0_23 = arith.constant 0 : index
    %65 = vector.load %arg11[%64, %c0_23] : memref<64x384xf32, #tpu.memory_space<vmem>>, vector<8x384xf32>
    %c0_24 = arith.constant 0 : index
    %c0_25 = arith.constant 0 : index
    %66 = vector.load %arg3[%c0_24, %c0_25] : memref<64x384xf32, #tpu.memory_space<vmem>>, vector<64x384xf32>
    %cst_26 = arith.constant dense<0.000000e+00> : vector<8x384xf32>
    %67 = tpu.matmul %61, %66, %cst_26 {dimension_numbers = #tpu.dot_dimension_numbers<[1], [0], [0], [1], [0, 0, 1, 1], [], []>} : vector<8x64xf32>, vector<64x384xf32>, vector<8x384xf32> -> vector<8x384xf32>
    %68 = vector.extract_strided_slice %65 {offsets = [0, 0], sizes = [8, 256], strides = [1, 1]} : vector<8x384xf32> to vector<8x256xf32>
    %69 = vector.extract_strided_slice %67 {offsets = [0, 0], sizes = [8, 256], strides = [1, 1]} : vector<8x384xf32> to vector<8x256xf32>
    %70 = arith.addf %68, %69 : vector<8x256xf32>
    %71 = arith.negf %70 : vector<8x256xf32>
    %72 = math.exp %71 : vector<8x256xf32>
    %cst_27 = arith.constant 1.000000e+00 : f32
    %73 = vector.broadcast %cst_27 : f32 to vector<8x256xf32>
    %74 = arith.addf %73, %72 : vector<8x256xf32>
    %75 = arith.divf %73, %74 : vector<8x256xf32>
    %76 = vector.extract_strided_slice %75 {offsets = [0, 0], sizes = [8, 64], strides = [1, 1]} : vector<8x256xf32> to vector<8x64xf32>
    %77 = vector.extract_strided_slice %75 {offsets = [0, 128], sizes = [8, 64], strides = [1, 1]} : vector<8x256xf32> to vector<8x64xf32>
    %78 = vector.extract_strided_slice %65 {offsets = [0, 256], sizes = [8, 64], strides = [1, 1]} : vector<8x384xf32> to vector<8x64xf32>
    %79 = vector.extract_strided_slice %67 {offsets = [0, 256], sizes = [8, 64], strides = [1, 1]} : vector<8x384xf32> to vector<8x64xf32>
    %80 = arith.addf %79, %10 : vector<8x64xf32>
    %81 = arith.mulf %76, %80 : vector<8x64xf32>
    %82 = arith.addf %78, %81 : vector<8x64xf32>
    %83 = math.tanh %82 : vector<8x64xf32>
    %84 = arith.subf %61, %83 : vector<8x64xf32>
    %85 = arith.mulf %77, %84 : vector<8x64xf32>
    %86 = arith.addf %83, %85 : vector<8x64xf32>
    %c3_i32 = arith.constant 3 : i32
    %c8_i32_28 = arith.constant 8 : i32
    %87 = arith.muli %c3_i32, %c8_i32_28 : i32
    %88 = tpu.assume_multiple %87, 8 : i32
    %89 = arith.index_cast %88 : i32 to index
    %c0_29 = arith.constant 0 : index
    %90 = vector.load %arg11[%89, %c0_29] : memref<64x384xf32, #tpu.memory_space<vmem>>, vector<8x384xf32>
    %c0_30 = arith.constant 0 : index
    %c0_31 = arith.constant 0 : index
    %91 = vector.load %arg3[%c0_30, %c0_31] : memref<64x384xf32, #tpu.memory_space<vmem>>, vector<64x384xf32>
    %cst_32 = arith.constant dense<0.000000e+00> : vector<8x384xf32>
    %92 = tpu.matmul %86, %91, %cst_32 {dimension_numbers = #tpu.dot_dimension_numbers<[1], [0], [0], [1], [0, 0, 1, 1], [], []>} : vector<8x64xf32>, vector<64x384xf32>, vector<8x384xf32> -> vector<8x384xf32>
    %93 = vector.extract_strided_slice %90 {offsets = [0, 0], sizes = [8, 256], strides = [1, 1]} : vector<8x384xf32> to vector<8x256xf32>
    %94 = vector.extract_strided_slice %92 {offsets = [0, 0], sizes = [8, 256], strides = [1, 1]} : vector<8x384xf32> to vector<8x256xf32>
    %95 = arith.addf %93, %94 : vector<8x256xf32>
    %96 = arith.negf %95 : vector<8x256xf32>
    %97 = math.exp %96 : vector<8x256xf32>
    %cst_33 = arith.constant 1.000000e+00 : f32
    %98 = vector.broadcast %cst_33 : f32 to vector<8x256xf32>
    %99 = arith.addf %98, %97 : vector<8x256xf32>
    %100 = arith.divf %98, %99 : vector<8x256xf32>
    %101 = vector.extract_strided_slice %100 {offsets = [0, 0], sizes = [8, 64], strides = [1, 1]} : vector<8x256xf32> to vector<8x64xf32>
    %102 = vector.extract_strided_slice %100 {offsets = [0, 128], sizes = [8, 64], strides = [1, 1]} : vector<8x256xf32> to vector<8x64xf32>
    %103 = vector.extract_strided_slice %90 {offsets = [0, 256], sizes = [8, 64], strides = [1, 1]} : vector<8x384xf32> to vector<8x64xf32>
    %104 = vector.extract_strided_slice %92 {offsets = [0, 256], sizes = [8, 64], strides = [1, 1]} : vector<8x384xf32> to vector<8x64xf32>
    %105 = arith.addf %104, %10 : vector<8x64xf32>
    %106 = arith.mulf %101, %105 : vector<8x64xf32>
    %107 = arith.addf %103, %106 : vector<8x64xf32>
    %108 = math.tanh %107 : vector<8x64xf32>
    %109 = arith.subf %86, %108 : vector<8x64xf32>
    %110 = arith.mulf %102, %109 : vector<8x64xf32>
    %111 = arith.addf %108, %110 : vector<8x64xf32>
    %c4_i32 = arith.constant 4 : i32
    %c8_i32_34 = arith.constant 8 : i32
    %112 = arith.muli %c4_i32, %c8_i32_34 : i32
    %113 = tpu.assume_multiple %112, 8 : i32
    %114 = arith.index_cast %113 : i32 to index
    %c0_35 = arith.constant 0 : index
    %115 = vector.load %arg11[%114, %c0_35] : memref<64x384xf32, #tpu.memory_space<vmem>>, vector<8x384xf32>
    %c0_36 = arith.constant 0 : index
    %c0_37 = arith.constant 0 : index
    %116 = vector.load %arg3[%c0_36, %c0_37] : memref<64x384xf32, #tpu.memory_space<vmem>>, vector<64x384xf32>
    %cst_38 = arith.constant dense<0.000000e+00> : vector<8x384xf32>
    %117 = tpu.matmul %111, %116, %cst_38 {dimension_numbers = #tpu.dot_dimension_numbers<[1], [0], [0], [1], [0, 0, 1, 1], [], []>} : vector<8x64xf32>, vector<64x384xf32>, vector<8x384xf32> -> vector<8x384xf32>
    %118 = vector.extract_strided_slice %115 {offsets = [0, 0], sizes = [8, 256], strides = [1, 1]} : vector<8x384xf32> to vector<8x256xf32>
    %119 = vector.extract_strided_slice %117 {offsets = [0, 0], sizes = [8, 256], strides = [1, 1]} : vector<8x384xf32> to vector<8x256xf32>
    %120 = arith.addf %118, %119 : vector<8x256xf32>
    %121 = arith.negf %120 : vector<8x256xf32>
    %122 = math.exp %121 : vector<8x256xf32>
    %cst_39 = arith.constant 1.000000e+00 : f32
    %123 = vector.broadcast %cst_39 : f32 to vector<8x256xf32>
    %124 = arith.addf %123, %122 : vector<8x256xf32>
    %125 = arith.divf %123, %124 : vector<8x256xf32>
    %126 = vector.extract_strided_slice %125 {offsets = [0, 0], sizes = [8, 64], strides = [1, 1]} : vector<8x256xf32> to vector<8x64xf32>
    %127 = vector.extract_strided_slice %125 {offsets = [0, 128], sizes = [8, 64], strides = [1, 1]} : vector<8x256xf32> to vector<8x64xf32>
    %128 = vector.extract_strided_slice %115 {offsets = [0, 256], sizes = [8, 64], strides = [1, 1]} : vector<8x384xf32> to vector<8x64xf32>
    %129 = vector.extract_strided_slice %117 {offsets = [0, 256], sizes = [8, 64], strides = [1, 1]} : vector<8x384xf32> to vector<8x64xf32>
    %130 = arith.addf %129, %10 : vector<8x64xf32>
    %131 = arith.mulf %126, %130 : vector<8x64xf32>
    %132 = arith.addf %128, %131 : vector<8x64xf32>
    %133 = math.tanh %132 : vector<8x64xf32>
    %134 = arith.subf %111, %133 : vector<8x64xf32>
    %135 = arith.mulf %127, %134 : vector<8x64xf32>
    %136 = arith.addf %133, %135 : vector<8x64xf32>
    %c5_i32 = arith.constant 5 : i32
    %c8_i32_40 = arith.constant 8 : i32
    %137 = arith.muli %c5_i32, %c8_i32_40 : i32
    %138 = tpu.assume_multiple %137, 8 : i32
    %139 = arith.index_cast %138 : i32 to index
    %c0_41 = arith.constant 0 : index
    %140 = vector.load %arg11[%139, %c0_41] : memref<64x384xf32, #tpu.memory_space<vmem>>, vector<8x384xf32>
    %c0_42 = arith.constant 0 : index
    %c0_43 = arith.constant 0 : index
    %141 = vector.load %arg3[%c0_42, %c0_43] : memref<64x384xf32, #tpu.memory_space<vmem>>, vector<64x384xf32>
    %cst_44 = arith.constant dense<0.000000e+00> : vector<8x384xf32>
    %142 = tpu.matmul %136, %141, %cst_44 {dimension_numbers = #tpu.dot_dimension_numbers<[1], [0], [0], [1], [0, 0, 1, 1], [], []>} : vector<8x64xf32>, vector<64x384xf32>, vector<8x384xf32> -> vector<8x384xf32>
    %143 = vector.extract_strided_slice %140 {offsets = [0, 0], sizes = [8, 256], strides = [1, 1]} : vector<8x384xf32> to vector<8x256xf32>
    %144 = vector.extract_strided_slice %142 {offsets = [0, 0], sizes = [8, 256], strides = [1, 1]} : vector<8x384xf32> to vector<8x256xf32>
    %145 = arith.addf %143, %144 : vector<8x256xf32>
    %146 = arith.negf %145 : vector<8x256xf32>
    %147 = math.exp %146 : vector<8x256xf32>
    %cst_45 = arith.constant 1.000000e+00 : f32
    %148 = vector.broadcast %cst_45 : f32 to vector<8x256xf32>
    %149 = arith.addf %148, %147 : vector<8x256xf32>
    %150 = arith.divf %148, %149 : vector<8x256xf32>
    %151 = vector.extract_strided_slice %150 {offsets = [0, 0], sizes = [8, 64], strides = [1, 1]} : vector<8x256xf32> to vector<8x64xf32>
    %152 = vector.extract_strided_slice %150 {offsets = [0, 128], sizes = [8, 64], strides = [1, 1]} : vector<8x256xf32> to vector<8x64xf32>
    %153 = vector.extract_strided_slice %140 {offsets = [0, 256], sizes = [8, 64], strides = [1, 1]} : vector<8x384xf32> to vector<8x64xf32>
    %154 = vector.extract_strided_slice %142 {offsets = [0, 256], sizes = [8, 64], strides = [1, 1]} : vector<8x384xf32> to vector<8x64xf32>
    %155 = arith.addf %154, %10 : vector<8x64xf32>
    %156 = arith.mulf %151, %155 : vector<8x64xf32>
    %157 = arith.addf %153, %156 : vector<8x64xf32>
    %158 = math.tanh %157 : vector<8x64xf32>
    %159 = arith.subf %136, %158 : vector<8x64xf32>
    %160 = arith.mulf %152, %159 : vector<8x64xf32>
    %161 = arith.addf %158, %160 : vector<8x64xf32>
    %c6_i32 = arith.constant 6 : i32
    %c8_i32_46 = arith.constant 8 : i32
    %162 = arith.muli %c6_i32, %c8_i32_46 : i32
    %163 = tpu.assume_multiple %162, 8 : i32
    %164 = arith.index_cast %163 : i32 to index
    %c0_47 = arith.constant 0 : index
    %165 = vector.load %arg11[%164, %c0_47] : memref<64x384xf32, #tpu.memory_space<vmem>>, vector<8x384xf32>
    %c0_48 = arith.constant 0 : index
    %c0_49 = arith.constant 0 : index
    %166 = vector.load %arg3[%c0_48, %c0_49] : memref<64x384xf32, #tpu.memory_space<vmem>>, vector<64x384xf32>
    %cst_50 = arith.constant dense<0.000000e+00> : vector<8x384xf32>
    %167 = tpu.matmul %161, %166, %cst_50 {dimension_numbers = #tpu.dot_dimension_numbers<[1], [0], [0], [1], [0, 0, 1, 1], [], []>} : vector<8x64xf32>, vector<64x384xf32>, vector<8x384xf32> -> vector<8x384xf32>
    %168 = vector.extract_strided_slice %165 {offsets = [0, 0], sizes = [8, 256], strides = [1, 1]} : vector<8x384xf32> to vector<8x256xf32>
    %169 = vector.extract_strided_slice %167 {offsets = [0, 0], sizes = [8, 256], strides = [1, 1]} : vector<8x384xf32> to vector<8x256xf32>
    %170 = arith.addf %168, %169 : vector<8x256xf32>
    %171 = arith.negf %170 : vector<8x256xf32>
    %172 = math.exp %171 : vector<8x256xf32>
    %cst_51 = arith.constant 1.000000e+00 : f32
    %173 = vector.broadcast %cst_51 : f32 to vector<8x256xf32>
    %174 = arith.addf %173, %172 : vector<8x256xf32>
    %175 = arith.divf %173, %174 : vector<8x256xf32>
    %176 = vector.extract_strided_slice %175 {offsets = [0, 0], sizes = [8, 64], strides = [1, 1]} : vector<8x256xf32> to vector<8x64xf32>
    %177 = vector.extract_strided_slice %175 {offsets = [0, 128], sizes = [8, 64], strides = [1, 1]} : vector<8x256xf32> to vector<8x64xf32>
    %178 = vector.extract_strided_slice %165 {offsets = [0, 256], sizes = [8, 64], strides = [1, 1]} : vector<8x384xf32> to vector<8x64xf32>
    %179 = vector.extract_strided_slice %167 {offsets = [0, 256], sizes = [8, 64], strides = [1, 1]} : vector<8x384xf32> to vector<8x64xf32>
    %180 = arith.addf %179, %10 : vector<8x64xf32>
    %181 = arith.mulf %176, %180 : vector<8x64xf32>
    %182 = arith.addf %178, %181 : vector<8x64xf32>
    %183 = math.tanh %182 : vector<8x64xf32>
    %184 = arith.subf %161, %183 : vector<8x64xf32>
    %185 = arith.mulf %177, %184 : vector<8x64xf32>
    %186 = arith.addf %183, %185 : vector<8x64xf32>
    %c7_i32 = arith.constant 7 : i32
    %c8_i32_52 = arith.constant 8 : i32
    %187 = arith.muli %c7_i32, %c8_i32_52 : i32
    %188 = tpu.assume_multiple %187, 8 : i32
    %189 = arith.index_cast %188 : i32 to index
    %c0_53 = arith.constant 0 : index
    %190 = vector.load %arg11[%189, %c0_53] : memref<64x384xf32, #tpu.memory_space<vmem>>, vector<8x384xf32>
    %c0_54 = arith.constant 0 : index
    %c0_55 = arith.constant 0 : index
    %191 = vector.load %arg3[%c0_54, %c0_55] : memref<64x384xf32, #tpu.memory_space<vmem>>, vector<64x384xf32>
    %cst_56 = arith.constant dense<0.000000e+00> : vector<8x384xf32>
    %192 = tpu.matmul %186, %191, %cst_56 {dimension_numbers = #tpu.dot_dimension_numbers<[1], [0], [0], [1], [0, 0, 1, 1], [], []>} : vector<8x64xf32>, vector<64x384xf32>, vector<8x384xf32> -> vector<8x384xf32>
    %193 = vector.extract_strided_slice %190 {offsets = [0, 0], sizes = [8, 256], strides = [1, 1]} : vector<8x384xf32> to vector<8x256xf32>
    %194 = vector.extract_strided_slice %192 {offsets = [0, 0], sizes = [8, 256], strides = [1, 1]} : vector<8x384xf32> to vector<8x256xf32>
    %195 = arith.addf %193, %194 : vector<8x256xf32>
    %196 = arith.negf %195 : vector<8x256xf32>
    %197 = math.exp %196 : vector<8x256xf32>
    %cst_57 = arith.constant 1.000000e+00 : f32
    %198 = vector.broadcast %cst_57 : f32 to vector<8x256xf32>
    %199 = arith.addf %198, %197 : vector<8x256xf32>
    %200 = arith.divf %198, %199 : vector<8x256xf32>
    %201 = vector.extract_strided_slice %200 {offsets = [0, 0], sizes = [8, 64], strides = [1, 1]} : vector<8x256xf32> to vector<8x64xf32>
    %202 = vector.extract_strided_slice %200 {offsets = [0, 128], sizes = [8, 64], strides = [1, 1]} : vector<8x256xf32> to vector<8x64xf32>
    %203 = vector.extract_strided_slice %190 {offsets = [0, 256], sizes = [8, 64], strides = [1, 1]} : vector<8x384xf32> to vector<8x64xf32>
    %204 = vector.extract_strided_slice %192 {offsets = [0, 256], sizes = [8, 64], strides = [1, 1]} : vector<8x384xf32> to vector<8x64xf32>
    %205 = arith.addf %204, %10 : vector<8x64xf32>
    %206 = arith.mulf %201, %205 : vector<8x64xf32>
    %207 = arith.addf %203, %206 : vector<8x64xf32>
    %208 = math.tanh %207 : vector<8x64xf32>
    %209 = arith.subf %186, %208 : vector<8x64xf32>
    %210 = arith.mulf %202, %209 : vector<8x64xf32>
    %211 = arith.addf %208, %210 : vector<8x64xf32>
    %c8_i32_58 = arith.constant 8 : i32
    %c0_59 = arith.constant 0 : index
    %c0_60 = arith.constant 0 : index
    %212 = vector.load %arg6[%c0_59, %c0_60] : memref<64x256xf32, #tpu.memory_space<vmem>>, vector<64x256xf32>
    %cst_61 = arith.constant dense<0.000000e+00> : vector<8x256xf32>
    %213 = tpu.matmul %211, %212, %cst_61 {dimension_numbers = #tpu.dot_dimension_numbers<[1], [0], [0], [1], [0, 0, 1, 1], [], []>} : vector<8x64xf32>, vector<64x256xf32>, vector<8x256xf32> -> vector<8x256xf32>
    %c0_62 = arith.constant 0 : index
    %c0_63 = arith.constant 0 : index
    %214 = vector.load %arg7[%c0_62, %c0_63] : memref<1x256xf32, #tpu.memory_space<vmem>>, vector<1x256xf32>
    %215 = vector.broadcast %214 : vector<1x256xf32> to vector<8x256xf32>
    %216 = arith.addf %213, %215 : vector<8x256xf32>
    %cst_64 = arith.constant 0.000000e+00 : f32
    %217 = vector.broadcast %cst_64 : f32 to vector<8x256xf32>
    %218 = arith.maximumf %216, %217 : vector<8x256xf32>
    %c0_65 = arith.constant 0 : index
    %c0_66 = arith.constant 0 : index
    %219 = vector.load %arg8[%c0_65, %c0_66] : memref<256x128xf32, #tpu.memory_space<vmem>>, vector<256x128xf32>
    %cst_67 = arith.constant dense<0.000000e+00> : vector<8x128xf32>
    %220 = tpu.matmul %218, %219, %cst_67 {dimension_numbers = #tpu.dot_dimension_numbers<[1], [0], [0], [1], [0, 0, 1, 1], [], []>} : vector<8x256xf32>, vector<256x128xf32>, vector<8x128xf32> -> vector<8x128xf32>
    %c0_68 = arith.constant 0 : index
    %c0_69 = arith.constant 0 : index
    %221 = vector.load %arg9[%c0_68, %c0_69] : memref<1x128xf32, #tpu.memory_space<vmem>>, vector<1x128xf32>
    %222 = vector.broadcast %221 : vector<1x128xf32> to vector<8x128xf32>
    %223 = arith.addf %220, %222 : vector<8x128xf32>
    %224 = vector.extract_strided_slice %223 {offsets = [0, 0], sizes = [8, 2], strides = [1, 1]} : vector<8x128xf32> to vector<8x2xf32>
    %cst_70 = arith.constant dense<0xFF800000> : vector<8xf32>
    %225 = vector.multi_reduction <maximumf>, %224, %cst_70 [1] : vector<8x2xf32> to vector<8xf32>
    %226 = vector.shape_cast %225 : vector<8xf32> to vector<8x1xf32>
    %227 = vector.broadcast %226 : vector<8x1xf32> to vector<8x2xf32>
    %228 = arith.subf %224, %227 : vector<8x2xf32>
    %229 = math.exp %228 : vector<8x2xf32>
    %cst_71 = arith.constant dense<0.000000e+00> : vector<8xf32>
    %230 = vector.multi_reduction <add>, %229, %cst_71 [1] : vector<8x2xf32> to vector<8xf32>
    %231 = vector.shape_cast %230 : vector<8xf32> to vector<8x1xf32>
    %232 = math.log %231 : vector<8x1xf32>
    %233 = arith.addf %226, %232 : vector<8x1xf32>
    %234 = vector.broadcast %233 : vector<8x1xf32> to vector<8x128xf32>
    %235 = arith.subf %223, %234 : vector<8x128xf32>
    %c0_72 = arith.constant 0 : index
    %c0_73 = arith.constant 0 : index
    %236 = vector.load %arg10[%c0_72, %c0_73] : memref<8x128xf32, #tpu.memory_space<vmem>>, vector<8x128xf32>
    tpu.vector_store %arg10[%c0_72, %c0_73], %235 {strides = array<i32>} : memref<8x128xf32, #tpu.memory_space<vmem>>, vector<8x128xf32>,
    return
  }
  func.func @transform_0(%arg0: i32) -> (i32, i32, i32) {
    %c0_i32 = arith.constant 0 : i32
    %c0_i32_0 = arith.constant 0 : i32
    %c0_i32_1 = arith.constant 0 : i32
    %c0_i32_2 = arith.constant 0 : i32
    return %c0_i32, %c0_i32_0, %c0_i32_1 : i32, i32, i32
  }
  func.func @transform_1(%arg0: i32) -> (i32, i32) {
    %c0_i32 = arith.constant 0 : i32
    %c0_i32_0 = arith.constant 0 : i32
    %c0_i32_1 = arith.constant 0 : i32
    return %c0_i32, %c0_i32_0 : i32, i32
  }
  func.func @transform_2(%arg0: i32) -> (i32, i32) {
    %c0_i32 = arith.constant 0 : i32
    %c0_i32_0 = arith.constant 0 : i32
    %c0_i32_1 = arith.constant 0 : i32
    return %c0_i32, %c0_i32_0 : i32, i32
  }
  func.func @transform_3(%arg0: i32) -> (i32, i32) {
    %c0_i32 = arith.constant 0 : i32
    %c0_i32_0 = arith.constant 0 : i32
    %c0_i32_1 = arith.constant 0 : i32
    return %c0_i32, %c0_i32_0 : i32, i32
  }
  func.func @transform_4(%arg0: i32) -> (i32, i32) {
    %c0_i32 = arith.constant 0 : i32
    %c0_i32_0 = arith.constant 0 : i32
    %c0_i32_1 = arith.constant 0 : i32
    return %c0_i32, %c0_i32_0 : i32, i32
  }
  func.func @transform_5(%arg0: i32) -> (i32, i32) {
    %c0_i32 = arith.constant 0 : i32
    %c0_i32_0 = arith.constant 0 : i32
    %c0_i32_1 = arith.constant 0 : i32
    return %c0_i32, %c0_i32_0 : i32, i32
  }
  func.func @transform_6(%arg0: i32) -> (i32, i32) {
    %c0_i32 = arith.constant 0 : i32
    %c0_i32_0 = arith.constant 0 : i32
    %c0_i32_1 = arith.constant 0 : i32
    return %c0_i32, %c0_i32_0 : i32, i32
  }
  func.func @transform_7(%arg0: i32) -> (i32, i32) {
    %c0_i32 = arith.constant 0 : i32
    %c0_i32_0 = arith.constant 0 : i32
    %c0_i32_1 = arith.constant 0 : i32
    return %c0_i32, %c0_i32_0 : i32, i32
  }
  func.func @transform_8(%arg0: i32) -> (i32, i32) {
    %c0_i32 = arith.constant 0 : i32
    %c0_i32_0 = arith.constant 0 : i32
    %c0_i32_1 = arith.constant 0 : i32
    return %c0_i32, %c0_i32_0 : i32, i32
  }
  func.func @transform_9(%arg0: i32) -> (i32, i32) {
    %c0_i32 = arith.constant 0 : i32
    %c0_i32_0 = arith.constant 0 : i32
    %c0_i32_1 = arith.constant 0 : i32
    return %c0_i32, %c0_i32_0 : i32, i32
  }
}

</mosaic_0001>

<bundles_post_ra>
// kernel: graph_rnn_classifier.1
= control target key start
LH: loop header
LB: loop body
LE: loop exit
PB: predicated region body
PF: predicated region fallthrough
CT: control target
= control target key end

     0   :  { %v2801_v3 = vmov 0.0   ;;  %vm2803_vm0 = vmmov 0   ;;  %vm384_vm1 = vcmask 523264   ;;  %vm1960_vm2 = vcmask 15360   ;;  %s3528_s1 = inlined_call_operand.vmem [shape: f32[128,384], index: 1, kind: input, shape index: {}]   ;;  %s3529_s0 = inlined_call_operand.vmem [shape: f32[8,8,128], index: 0, kind: input, shape index: {}]   ;;  %s3530_s2 = inlined_call_operand.vmem [shape: f32[64,384], index: 2, kind: input, shape index: {}]   ;;  %s3531_s3 = inlined_call_operand.vmem [shape: f32[1,384], index: 3, kind: input, shape index: {}]   ;;  %s3532_s4 = inlined_call_operand.vmem [shape: f32[1,64], index: 4, kind: input, shape index: {}]   ;;  %s3533_s5 = inlined_call_operand.vmem [shape: f32[64,256], index: 5, kind: input, shape index: {}]   ;;  %s3534_s7 = inlined_call_operand.vmem [shape: f32[256,128], index: 7, kind: input, shape index: {}]   ;;  %s3535_s6 = inlined_call_operand.vmem [shape: f32[1,256], index: 6, kind: input, shape index: {}]   ;;  %s3536_s8 = inlined_call_operand.vmem [shape: f32[1,128], index: 8, kind: input, shape index: {}]   ;;  %s3537_s9 = inlined_call_operand.vmem [shape: f32[8,128], index: 9, kind: output, shape index: {}]  }
   0x1   :  { %v42_v0 = vld [vmem:[%s3528_s1 + $0x10] sm:$0xff]  ;;  %v45_v1 = vld [vmem:[%s3528_s1 + $0x28] sm:$0xff]  ;;  %v48_v2 = vld [vmem:[%s3528_s1 + $0x40] sm:$0xff]  ;;  %169 = vmatprep.mubr.f32.mxu0 %v2801_v3 }
   0x2   :  { %v2378_v4 = vpack.c.bf16 %v45_v1, %v42_v0  ;;  %v51_v5 = vld [vmem:[%s3528_s1 + $0x58] sm:$0xff]  ;;  %v54_v7 = vld [vmem:[%s3528_s1 + $0x70] sm:$0xff]  ;;  %v57_v8 = vld [vmem:[%s3528_s1 + $0x88] sm:$0xff] }
   0x3   :  { %v2382_v6 = vpack.c.bf16 %v51_v5, %v48_v2  ;;  %v41_v9 = vld [vmem:[%s3528_s1 + $0x8] sm:$0xff]  ;;  %v44_v10 = vld [vmem:[%s3528_s1 + $0x20] sm:$0xff]  ;;  %v43_v12 = vld [vmem:[%s3528_s1 + $0x18] sm:$0xff]  ;;  %v2386_v16 = vpack.c.bf16 %v57_v8, %v54_v7 }
   0x4   :  { %2379 = vmatprep.subr.bf16.mxu1 %v2378_v4  ;;  %v40_v11 = vld [vmem:[%s3528_s1] sm:$0xff]  ;;  %v2346_v13 = vpack.c.bf16 %v44_v10, %v41_v9  ;;  %v47_v15 = vld [vmem:[%s3528_s1 + $0x38] sm:$0xff]  ;;  %v50_v17 = vld [vmem:[%s3528_s1 + $0x50] sm:$0xff] }
   0x5   :  { %2381 = vmatpush3.bf16.msra.mxu1 %v2378_v4  ;;  %v2348_v14 = vpack.c.bf16 %v43_v12, %v40_v11  ;;  %v46_v18 = vld [vmem:[%s3528_s1 + $0x30] sm:$0xff]  ;;  %v49_v19 = vld [vmem:[%s3528_s1 + $0x48] sm:$0xff]  ;;  %v60_v20 = vld [vmem:[%s3528_s1 + $0xa0] sm:$0xff]  ;;  %v2350_v22 = vpack.c.bf16 %v50_v17, %v47_v15 }
   0x6   :  { %2383 = vmatprep.subr.bf16.mxu1 %v2382_v6  ;;  %v63_v21 = vld [vmem:[%s3528_s1 + $0xb8] sm:$0xff]  ;;  %2347 = vmatprep.subr.bf16.mxu0 %v2346_v13  ;;  %v53_v23 = vld [vmem:[%s3528_s1 + $0x68] sm:$0xff]  ;;  %v2352_v24 = vpack.c.bf16 %v49_v19, %v46_v18  ;;  %v56_v25 = vld [vmem:[%s3528_s1 + $0x80] sm:$0xff] }
   0x7   :  { %2349 = vmatpush1.bf16.msra.mxu0 %v2348_v14  ;;  %v2354_v26 = vpack.c.bf16 %v56_v25, %v53_v23  ;;  %v52_v27 = vld [vmem:[%s3528_s1 + $0x60] sm:$0xff]  ;;  %v55_v28 = vld [vmem:[%s3528_s1 + $0x78] sm:$0xff]  ;;  %v2390_v29 = vpack.c.bf16 %v63_v21, %v60_v20  ;;  %v62_v31 = vld [vmem:[%s3528_s1 + $0xb0] sm:$0xff] }
   0x8   :  { %2351 = vmatprep.subr.bf16.mxu0 %v2350_v22  ;;  %v59_v30 = vld [vmem:[%s3528_s1 + $0x98] sm:$0xff]  ;;  %v66_v32 = vld [vmem:[%s3528_s1 + $0xd0] sm:$0xff]  ;;  %v69_v33 = vld [vmem:[%s3528_s1 + $0xe8] sm:$0xff]  ;;  %v2356_v34 = vpack.c.bf16 %v55_v28, %v52_v27 }
   0x9   :  { %2385 = vmatpush3.bf16.msra.mxu1 %v2382_v6  ;;  %v2358_v35 = vpack.c.bf16 %v62_v31, %v59_v30  ;;  %v58_v36 = vld [vmem:[%s3528_s1 + $0x90] sm:$0xff]  ;;  %v61_v37 = vld [vmem:[%s3528_s1 + $0xa8] sm:$0xff]  ;;  %v2936_v38 = vld [vmem:[%s3529_s0] sm:$0xff]  ;;  %v2394_v39 = vpack.c.bf16 %v69_v33, %v66_v32 }
   0xa   :  { %2387 = vmatprep.subr.bf16.mxu1 %v2386_v16  ;;  %v65_v40 = vld [vmem:[%s3528_s1 + $0xc8] sm:$0xff]  ;;  %v68_v41 = vld [vmem:[%s3528_s1 + $0xe0] sm:$0xff]  ;;  %2182 = vmatprep.mubr.f32.mxu1 %v2936_v38  ;;  %v75_v43 = vld [vmem:[%s3528_s1 + $0x118] sm:$0xff]  ;;  %v2360_v44 = vpack.c.bf16 %v61_v37, %v58_v36 }
   0xb   :  { %2353 = vmatpush1.bf16.msra.mxu0 %v2352_v24  ;;  %v72_v42 = vld [vmem:[%s3528_s1 + $0x100] sm:$0xff]  ;;  %v2362_v45 = vpack.c.bf16 %v68_v41, %v65_v40  ;;  %v67_v47 = vld [vmem:[%s3528_s1 + $0xd8] sm:$0xff]  ;;  %v74_v50 = vld [vmem:[%s3528_s1 + $0x110] sm:$0xff] }
   0xc   :  { %2355 = vmatprep.subr.bf16.mxu0 %v2354_v26  ;;  %v64_v46 = vld [vmem:[%s3528_s1 + $0xc0] sm:$0xff]  ;;  %v2398_v48 = vpack.c.bf16 %v75_v43, %v72_v42  ;;  %v71_v49 = vld [vmem:[%s3528_s1 + $0xf8] sm:$0xff]  ;;  %v78_v51 = vld [vmem:[%s3528_s1 + $0x130] sm:$0xff] }
   0xd   :  { %2389 = vmatpush3.bf16.msra.mxu1 %v2386_v16  ;;  %v81_v52 = vld [vmem:[%s3528_s1 + $0x148] sm:$0xff]  ;;  %v2364_v53 = vpack.c.bf16 %v67_v47, %v64_v46  ;;  %v2366_v54 = vpack.c.bf16 %v74_v50, %v71_v49  ;;  %v70_v55 = vld [vmem:[%s3528_s1 + $0xf0] sm:$0xff]  ;;  %v80_v59 = vld [vmem:[%s3528_s1 + $0x140] sm:$0xff] }
   0xe   :  { %2391 = vmatprep.subr.bf16.mxu1 %v2390_v29  ;;  %v73_v56 = vld [vmem:[%s3528_s1 + $0x108] sm:$0xff]  ;;  %v2402_v57 = vpack.c.bf16 %v81_v52, %v78_v51  ;;  %v84_v60 = vld [vmem:[%s3528_s1 + $0x160] sm:$0xff]  ;;  %v87_v61 = vld [vmem:[%s3528_s1 + $0x178] sm:$0xff] }
   0xf   :  { %2357 = vmatpush1.bf16.msra.mxu0 %v2356_v34  ;;  %v77_v58 = vld [vmem:[%s3528_s1 + $0x128] sm:$0xff]  ;;  %v2368_v62 = vpack.c.bf16 %v73_v56, %v70_v55  ;;  %v76_v0 = vld [vmem:[%s3528_s1 + $0x120] sm:$0xff]  ;;  %v79_v1 = vld [vmem:[%s3528_s1 + $0x138] sm:$0xff]  ;;  %v2406_v2 = vpack.c.bf16 %v87_v61, %v84_v60  ;;  %v90_v55 = vlaneseq }
  0x10   :  { %2359 = vmatprep.subr.bf16.mxu0 %v2358_v35  ;;  %v2370_v63 = vpack.c.bf16 %v80_v59, %v77_v58  ;;  %v83_v4 = vld [vmem:[%s3528_s1 + $0x158] sm:$0xff]  ;;  %v86_v5 = vld [vmem:[%s3528_s1 + $0x170] sm:$0xff]  ;;  %v361_v6 = vld [vmem:[%s3530_s2 + $0x8] sm:$0xff]  ;;  %v2372_v8 = vpack.c.bf16 %v79_v1, %v76_v0 }
  0x11   :  { %2393 = vmatpush3.bf16.msra.mxu1 %v2390_v29  ;;  %v364_v7 = vld [vmem:[%s3530_s2 + $0x20] sm:$0xff]  ;;  %v2374_v9 = vpack.c.bf16 %v86_v5, %v83_v4  ;;  %v82_v10 = vld [vmem:[%s3528_s1 + $0x150] sm:$0xff]  ;;  %v85_v11 = vld [vmem:[%s3528_s1 + $0x168] sm:$0xff]  ;;  %v3172_v56 = vshrl.u32 %v90_v55, 7 }
  0x12   :  { %2395 = vmatprep.subr.bf16.mxu1 %v2394_v39  ;;  %v3011_v12 = vpack.c.bf16 %v364_v7, %v361_v6  ;;  %v360_v13 = vld [vmem:[%s3530_s2] sm:$0xff]  ;;  %v363_v14 = vld [vmem:[%s3530_s2 + $0x18] sm:$0xff]  ;;  %v370_v16 = vld [vmem:[%s3530_s2 + $0x50] sm:$0xff]  ;;  %v2376_v17 = vpack.c.bf16 %v85_v11, %v82_v10 }
  0x13   :  { %2361 = vmatpush1.bf16.msra.mxu0 %v2360_v44  ;;  %v367_v15 = vld [vmem:[%s3530_s2 + $0x38] sm:$0xff]  ;;  %v33_v18 = vld [vmem:[%s3529_s0 + $0x8] sm:$0xff]  ;;  %v3028_v19 = vpack.c.bf16 %v363_v14, %v360_v13  ;;  %v34_v20 = vld [vmem:[%s3529_s0 + $0x10] sm:$0xff]  ;;  %v92_v5 = vsub.s32 0, %v3172_v56  ;;  %v96_v7 = vsub.s32 1, %v3172_v56 }
  0x14   :  { %2363 = vmatprep.subr.bf16.mxu0 %v2362_v45  ;;  %v3034_v21 = vpack.c.bf16 %v370_v16, %v367_v15  ;;  %v366_v22 = vld [vmem:[%s3530_s2 + $0x30] sm:$0xff]  ;;  %v369_v23 = vld [vmem:[%s3530_s2 + $0x48] sm:$0xff]  ;;  %v376_v25 = vld [vmem:[%s3530_s2 + $0x80] sm:$0xff]  ;;  %v2802_v45 = vmov 0.0|0.0  }
  0x15   :  { %2397 = vmatpush3.bf16.msra.mxu1 %v2394_v39  ;;  %v373_v24 = vld [vmem:[%s3530_s2 + $0x68] sm:$0xff]  ;;  %v35_v26 = vld [vmem:[%s3529_s0 + $0x18] sm:$0xff]  ;;  %v3052_v27 = vpack.c.bf16 %v369_v23, %v366_v22  ;;  %v36_v28 = vld [vmem:[%s3529_s0 + $0x20] sm:$0xff] }
  0x16   :  { %2399 = vmatprep.subr.bf16.mxu1 %v2398_v48  ;;  %v3058_v29 = vpack.c.bf16 %v376_v25, %v373_v24  ;;  %v372_v30 = vld [vmem:[%s3530_s2 + $0x60] sm:$0xff]  ;;  %v375_v31 = vld [vmem:[%s3530_s2 + $0x78] sm:$0xff]  ;;  %v382_v33 = vld [vmem:[%s3530_s2 + $0xb0] sm:$0xff] }
  0x17   :  { %2365 = vmatpush1.bf16.msra.mxu0 %v2364_v53  ;;  %v379_v32 = vld [vmem:[%s3530_s2 + $0x98] sm:$0xff]  ;;  %v37_v34 = vld [vmem:[%s3529_s0 + $0x28] sm:$0xff]  ;;  %v3079_v35 = vpack.c.bf16 %v375_v31, %v372_v30  ;;  %v38_v36 = vld [vmem:[%s3529_s0 + $0x30] sm:$0xff] }
  0x18   :  { %2367 = vmatprep.subr.bf16.mxu0 %v2366_v54  ;;  %v3085_v37 = vpack.c.bf16 %v382_v33, %v379_v32  ;;  %v381_v39 = vld [vmem:[%s3530_s2 + $0xa8] sm:$0xff]  ;;  %v39_v40 = vld [vmem:[%s3529_s0 + $0x38] sm:$0xff]  ;;  %v362_v42 = vld [vmem:[%s3530_s2 + $0x10] sm:$0xff] }
  0x19   :  { %2401 = vmatpush3.bf16.msra.mxu1 %v2398_v48  ;;  %v365_v43 = vld [vmem:[%s3530_s2 + $0x28] sm:$0xff]  ;;  %v368_v46 = vld [vmem:[%s3530_s2 + $0x40] sm:$0xff]  ;;  %v371_v47 = vld [vmem:[%s3530_s2 + $0x58] sm:$0xff] }
  0x1a   :  { %2403 = vmatprep.subr.bf16.mxu1 %v2402_v57  ;;  %v3114_v44 = vpack.c.bf16 %v365_v43, %v362_v42  ;;  %v3128_v48 = vpack.c.bf16 %v371_v47, %v368_v46  ;;  %v374_v49 = vld [vmem:[%s3530_s2 + $0x70] sm:$0xff]  ;;  %v377_v50 = vld [vmem:[%s3530_s2 + $0x88] sm:$0xff]  ;;  %v380_v52 = vld [vmem:[%s3530_s2 + $0xa0] sm:$0xff] }
  0x1b   :  { %2369 = vmatpush1.bf16.msra.mxu0 %v2368_v62  ;;  %v3143_v51 = vpack.c.bf16 %v377_v50, %v374_v49  ;;  %v383_v53 = vld [vmem:[%s3530_s2 + $0xb8] sm:$0xff]  ;;  %v88_v58 = vld [vmem:[%s3531_s3] sm:$0x7] }
  0x1c   :  { %2371 = vmatprep.subr.bf16.mxu0 %v2370_v63  ;;  %v3154_v54 = vpack.c.bf16 %v383_v53, %v380_v52  ;;  %v3190_v11 = vrot.slane %v88_v58, %v92_v5  ;;  %v3196_v14 = vrot.slane %v88_v58, %v96_v7 }
  0x1d   :  { %2405 = vmatpush3.bf16.msra.mxu1 %v2402_v57  ;;  %v100_v57 = vsub.s32 2, %v3172_v56 }
  0x1e   :  { %2407 = vmatprep.subr.bf16.mxu1 %v2406_v2 }
  0x1f   :  { %2373 = vmatpush1.bf16.msra.mxu0 %v2372_v8  ;;  %v101_v59 = vrot.slane %v88_v58, %v100_v57 }
  0x20   :  { %2375 = vmatprep.subr.bf16.mxu0 %v2374_v9 }
  0x21   :  { %2409 = vmatpush3.bf16.msra.mxu1 %v2406_v2 }
  0x22   :  { %2411 = vmatprep.subr.bf16.mxu1 %v3011_v12 }
  0x23   :  { %2377 = vmatpush1.bf16.msra.mxu0 %v2376_v17 }
  0x24   :  { %2183 = vmatmul.mubr.f32.vlgmr.msra.gmra.mrb[0].mxu1 %v33_v18  ;;  %2439 = vmatprep.subr.bf16.mxu0 %v3011_v12 }
  0x25   :  { %2413 = vmatpush1.bf16.msra.mxu1 %v3028_v19  ;;  %2185 = vmatprep.mubr.f32.mxu1 %v34_v20 }
  0x26   :  { %2415 = vmatprep.subr.bf16.mxu1 %v3034_v21  ;;  %170 = vmatmul.mubr.f32.vlgmr.msra.gmra.mrb[0].mxu0 %v2936_v38  ;;  %v378_v38 = vld [vmem:[%s3530_s2 + $0x90] sm:$0xff] }
  0x27   :  { %2441 = vmatpush1.bf16.msra.mxu0 %v3028_v19  ;;  %175 = vmatprep.mubr.f32.mxu0 %v2801_v3  ;;  %v3100_v41 = vpack.c.bf16 %v381_v39, %v378_v38 }
  0x28   :  { %2186 = vmatmul.mubr.f32.gmra.mrb[2].mxu1 %v35_v26  ;;  %2443 = vmatprep.subr.bf16.mxu0 %v3034_v21 }
  0x29   :  { %2417 = vmatpush1.bf16.msra.mxu1 %v3052_v27  ;;  %2188 = vmatprep.mubr.f32.mxu1 %v36_v28 }
  0x2a   :  { %2419 = vmatprep.subr.bf16.mxu1 %v3058_v29  ;;  %176 = vmatmul.mubr.f32.gmra.mrb[2].mxu0 %v33_v18 }
  0x2b   :  { %181 = vmatprep.mubr.f32.mxu0 %v2801_v3  ;;  %2445 = vmatpush1.bf16.msra.mxu0 %v3052_v27 }
  0x2c   :  { %2189 = vmatmul.mubr.f32.gmra.mrb[4].mxu1 %v37_v34  ;;  %2447 = vmatprep.subr.bf16.mxu0 %v3058_v29 }
  0x2d   :  { %2421 = vmatpush1.bf16.msra.mxu1 %v3079_v35  ;;  %2191 = vmatprep.mubr.f32.mxu1 %v38_v36 }
  0x2e   :  { %2423 = vmatprep.subr.bf16.mxu1 %v3085_v37  ;;  %182 = vmatmul.mubr.f32.gmra.mrb[4].mxu0 %v34_v20 }
  0x2f   :  { %187 = vmatprep.mubr.f32.mxu0 %v2801_v3  ;;  %2449 = vmatpush1.bf16.msra.mxu0 %v3079_v35 }
  0x30   :  { %2192 = vmatmul.mubr.f32.gmra.mrb[6].mxu1 %v39_v40  ;;  %2451 = vmatprep.subr.bf16.mxu0 %v3085_v37 }
  0x31   :  { %2425 = vmatpush1.bf16.msra.mxu1 %v3100_v41  ;;  %452 = vmatprep.mubr.f32.mxu1 %v2801_v3 }
  0x32   :  { %2426 = vmatprep.subr.bf16.mxu1 %v2802_v45  ;;  %188 = vmatmul.mubr.f32.gmra.mrb[6].mxu0 %v35_v26 }
  0x33   :  { %193 = vmatprep.mubr.f32.mxu0 %v2801_v3  ;;  %2453 = vmatpush1.bf16.msra.mxu0 %v3100_v41 }
  0x34   :  { %453 = vmatmul.mubr.f32.vlgmr.msra.gmra.mrb[8].mxu1 %v2801_v3  ;;  %2467 = vmatprep.subr.bf16.mxu0 %v3011_v12 }
  0x35   :  { %2428 = vmatpush3.bf16.msra.mxu1 %v3114_v44  ;;  %2210 = vmatprep.mubr.msk.f32.mxu1 %vm2803_vm0, %v2801_v3 }
  0x36   :  { %2429 = vmatprep.subr.bf16.mxu1 %v2802_v45  ;;  %194 = vmatmul.mubr.f32.gmra.mrb[8].mxu0 %v36_v28 }
  0x37   :  { %199 = vmatprep.mubr.f32.mxu0 %v2801_v3 }
  0x39   :  { %2431 = vmatpush3.bf16.msra.mxu1 %v3128_v48 }
  0x3a   :  { %2432 = vmatprep.subr.bf16.mxu1 %v2802_v45  ;;  %200 = vmatmul.mubr.f32.gmra.mrb[10].mxu0 %v37_v34 }
  0x3b   :  { %205 = vmatprep.mubr.f32.mxu0 %v2801_v3 }
  0x3d   :  { %2434 = vmatpush3.bf16.msra.mxu1 %v3143_v51 }
  0x3e   :  { %2435 = vmatprep.subr.bf16.mxu1 %v2802_v45  ;;  %206 = vmatmul.mubr.f32.gmra.mrb[12].mxu0 %v38_v36  ;;  %v3207_v36 = vld [vmem:[%s3532_s4] ss:$0 sm:$0xff] }
  0x3f   :  { %211 = vmatprep.mubr.f32.mxu0 %v2801_v3 }
  0x41   :  { %2437 = vmatpush3.bf16.msra.mxu1 %v3154_v54 }
  0x42   :  { %2454 = vmatprep.subr.bf16.mxu1 %v2802_v45  ;;  %212 = vmatmul.mubr.f32.gmra.mrb[14].mxu0 %v39_v40 }
  0x43   :  { %623 = vmatprep.mubr.f32.mxu0 %v2801_v3 }
  0x44   :  { %2211 = vmatmul.mubr.f32.vlgmr.msra.gmra.mrb[10].mxu1 %v2801_v3 }
  0x45   :  { %2456 = vmatpush3.bf16.msra.mxu1 %v3114_v44  ;;  %2229 = vmatprep.mubr.msk.f32.mxu1 %vm2803_vm0, %v2801_v3 }
  0x46   :  { %2457 = vmatprep.subr.bf16.mxu1 %v2802_v45 }
  0x49   :  { %2459 = vmatpush3.bf16.msra.mxu1 %v3128_v48 }
  0x4a   :  { %2460 = vmatprep.subr.bf16.mxu1 %v2802_v45 }
  0x4d   :  { %2462 = vmatpush3.bf16.msra.mxu1 %v3143_v51 }
  0x4e   :  { %2463 = vmatprep.subr.bf16.mxu1 %v2802_v45 }
  0x51   :  { %2465 = vmatpush3.bf16.msra.mxu1 %v3154_v54 }
  0x52   :  { %2482 = vmatprep.subr.bf16.mxu1 %v2802_v45 }
  0xf7   :  { %v2184_v60 = vpop.f32.mrb[0].mxu1 }
  0xf8   :  { %v3178_v61 = vadd.f32 %v2184_v60, %v101_v59  ;;  %v284_v62 = vpop.f32.mrb[1].mxu1 }
  0xf9   :  { %v171_v63 = vpop.f32.mrb[0].mxu0  ;;  %v285_v42 = vadd.f32 %v284_v62, %v101_v59 }
  0xfa   :  { %v173_v1 = vpop.f32.mrb[1].mxu0  ;;  %v172_v18 = vadd.f32 %v171_v63, %v3190_v11 }
  0xfb   :  { %v2187_v0 = vpop.f32.mrb[2].mxu1  ;;  %v174_v22 = vadd.f32 %v173_v1, %v3196_v14 }
  0xfc   :  { %v3180_v2 = vadd.f32 %v2187_v0, %v101_v59  ;;  %v294_v4 = vpop.f32.mrb[3].mxu1 }
  0xfd   :  { %v3183_v6 = vadd.f32 %v294_v4, %v101_v59 }
  0xff   :  { %v2190_v8 = vpop.f32.mrb[4].mxu1 }
 0x100   :  { %v3186_v9 = vadd.f32 %v2190_v8, %v101_v59  ;;  %v304_v10 = vpop.f32.mrb[5].mxu1 }
 0x101   :  { %v3192_v13 = vadd.f32 %v304_v10, %v101_v59 }
 0x103   :  { %v2193_v15 = vpop.f32.mrb[6].mxu1 }
 0x104   :  { %v3198_v16 = vadd.f32 %v2193_v15, %v101_v59  ;;  %v314_v17 = vpop.f32.mrb[7].mxu1 }
 0x105   :  { %v3201_v20 = vadd.f32 %v314_v17, %v101_v59 }
 0x107   :  { %v454_v23 = vpop.f32.mrb[8].mxu1 }
 0x108   :  { %v529_v24 = vadd.f32 %v454_v23, %v172_v18  ;;  %v456_v25 = vpop.f32.mrb[9].mxu1 }
 0x109   :  { %v530_v26 = vadd.f32 %v456_v25, %v174_v22 }
 0x10a   :  { %v1987_v28 = vmul.f32 -1.442695, %v529_v24 }
 0x10b   :  { %v1988_v30 = vmul.f32 -1.442695, %v530_v26 }
 0x10c   :  { %2717 = vpow2.f32 %v1987_v28 }
 0x10d   :  { %2719 = vpow2.f32 %v1988_v30 }
 0x116   :  { %v2718_v31 = vpop.eup %2717 }
 0x117   :  { %v537_v32 = vadd.f32 1.0, %v2718_v31  ;;  %v525_v33 = vpop.f32.mrb[10].mxu1  ;;  %v2720_v39 = vpop.eup %2719 }
 0x118   :  { %v2212_v34 = vpop.f32.mrb[11].mxu1  ;;  %v543_v38 = vadd.f32 %v3207_v36, %v525_v33  ;;  %v538_v46 = vadd.f32 1.0, %v2720_v39 }
 0x119   :  { %2721 = vrcp.f32 %v537_v32 }
 0x123   :  { %v2722_v40 = vpop.eup %2721 }
 0x124   :  { %v544_v43 = vmul.f32 %v2722_v40, %v543_v38 }
 0x126   :  { %v545_v47 = vadd.f32 %v544_v43, %v285_v42 }
 0x128   :  { %2723 = vtanh.f32 %v545_v47 }
 0x129   :  { %2725 = vrcp.f32 %v538_v46 }
 0x132   :  { %v2724_v49 = vpop.eup %2723 }
 0x133   :  { %v547_v50 = vsub.f32 0.0, %v2724_v49  ;;  %v2726_v52 = vpop.eup %2725 }
 0x135   :  { %v548_v53 = vmul.f32 %v2726_v52, %v547_v50 }
 0x137   :  { %v549_v55 = vadd.f32 %v2724_v49, %v548_v53 }
 0x139   :  { %1989 = vmatmul.mubr.msk.f32.vlgmr.msra.gmra.mrb[2].mxu0 %vm384_vm1, %v549_v55  ;;  %2230 = vmatmul.mubr.msk.f32.vlgmr.msra.gmra.mrb[12].mxu1 %vm384_vm1, %v549_v55 }
 0x13a   :  { %2469 = vmatpush1.bf16.msra.mxu0 %v3028_v19  ;;  %2484 = vmatpush3.bf16.msra.mxu1 %v3114_v44 }
 0x13b   :  { %2471 = vmatprep.subr.bf16.mxu0 %v3034_v21  ;;  %2485 = vmatprep.subr.bf16.mxu1 %v2802_v45 }
 0x13c   :  { %794 = vmatprep.mubr.f32.mxu0 %v2801_v3  ;;  %2248 = vmatprep.mubr.msk.f32.mxu1 %vm2803_vm0, %v2801_v3 }
 0x13e   :  { %2473 = vmatpush1.bf16.msra.mxu0 %v3052_v27  ;;  %2487 = vmatpush3.bf16.msra.mxu1 %v3128_v48 }
 0x13f   :  { %2475 = vmatprep.subr.bf16.mxu0 %v3058_v29  ;;  %2488 = vmatprep.subr.bf16.mxu1 %v2802_v45 }
 0x142   :  { %2477 = vmatpush1.bf16.msra.mxu0 %v3079_v35  ;;  %2490 = vmatpush3.bf16.msra.mxu1 %v3143_v51 }
 0x143   :  { %2479 = vmatprep.subr.bf16.mxu0 %v3085_v37  ;;  %2491 = vmatprep.subr.bf16.mxu1 %v2802_v45 }
 0x146   :  { %2481 = vmatpush1.bf16.msra.mxu0 %v3100_v41  ;;  %2493 = vmatpush3.bf16.msra.mxu1 %v3154_v54 }
 0x147   :  { %2495 = vmatprep.subr.bf16.mxu0 %v3011_v12  ;;  %2510 = vmatprep.subr.bf16.mxu1 %v2802_v45 }
 0x20c   :  { %v625_v57 = vpop.f32.mrb[2].mxu0  ;;  %v696_v58 = vpop.f32.mrb[12].mxu1 }
 0x20d   :  { %v2686_v59 = vadd.f32 %v625_v57, %v3190_v11  ;;  %v627_v60 = vpop.f32.mrb[3].mxu0  ;;  %v2231_v62 = vpop.f32.mrb[13].mxu1  ;;  %v714_v15 = vadd.f32 %v3207_v36, %v696_v58 }
 0x20e   :  { %v2687_v0 = vadd.f32 %v627_v60, %v3196_v14 }
 0x20f   :  { %v1991_v63 = vmul.f32 -1.442695, %v2686_v59 }
 0x210   :  { %v1992_v1 = vmul.f32 -1.442695, %v2687_v0 }
 0x211   :  { %2727 = vpow2.f32 %v1991_v63 }
 0x212   :  { %2729 = vpow2.f32 %v1992_v1 }
 0x21b   :  { %v2728_v4 = vpop.eup %2727 }
 0x21c   :  { %v708_v8 = vadd.f32 1.0, %v2728_v4  ;;  %v2730_v10 = vpop.eup %2729 }
 0x21d   :  { %v709_v23 = vadd.f32 1.0, %v2730_v10 }
 0x21e   :  { %2731 = vrcp.f32 %v708_v8 }
 0x228   :  { %v2732_v17 = vpop.eup %2731 }
 0x229   :  { %v715_v18 = vmul.f32 %v2732_v17, %v714_v15 }
 0x22b   :  { %v716_v22 = vadd.f32 %v715_v18, %v3178_v61 }
 0x22d   :  { %2733 = vtanh.f32 %v716_v22 }
 0x22e   :  { %2735 = vrcp.f32 %v709_v23 }
 0x237   :  { %v2734_v24 = vpop.eup %2733 }
 0x238   :  { %v718_v25 = vsub.f32 %v549_v55, %v2734_v24  ;;  %v2736_v26 = vpop.eup %2735 }
 0x23a   :  { %v719_v28 = vmul.f32 %v2736_v26, %v718_v25 }
 0x23c   :  { %v720_v30 = vadd.f32 %v2734_v24, %v719_v28 }
 0x23e   :  { %1993 = vmatmul.mubr.msk.f32.vlgmr.msra.gmra.mrb[4].mxu0 %vm384_vm1, %v720_v30  ;;  %2249 = vmatmul.mubr.msk.f32.vlgmr.msra.gmra.mrb[14].mxu1 %vm384_vm1, %v720_v30 }
 0x23f   :  { %2497 = vmatpush1.bf16.msra.mxu0 %v3028_v19  ;;  %2512 = vmatpush3.bf16.msra.mxu1 %v3114_v44 }
 0x240   :  { %2499 = vmatprep.subr.bf16.mxu0 %v3034_v21  ;;  %2513 = vmatprep.subr.bf16.mxu1 %v2802_v45 }
 0x241   :  { %965 = vmatprep.mubr.f32.mxu0 %v2801_v3  ;;  %2267 = vmatprep.mubr.msk.f32.mxu1 %vm2803_vm0, %v2801_v3 }
 0x243   :  { %2501 = vmatpush1.bf16.msra.mxu0 %v3052_v27  ;;  %2515 = vmatpush3.bf16.msra.mxu1 %v3128_v48 }
 0x244   :  { %2503 = vmatprep.subr.bf16.mxu0 %v3058_v29  ;;  %2516 = vmatprep.subr.bf16.mxu1 %v2802_v45 }
 0x247   :  { %2505 = vmatpush1.bf16.msra.mxu0 %v3079_v35  ;;  %2518 = vmatpush3.bf16.msra.mxu1 %v3143_v51 }
 0x248   :  { %2507 = vmatprep.subr.bf16.mxu0 %v3085_v37  ;;  %2519 = vmatprep.subr.bf16.mxu1 %v2802_v45 }
 0x24b   :  { %2509 = vmatpush1.bf16.msra.mxu0 %v3100_v41  ;;  %2521 = vmatpush3.bf16.msra.mxu1 %v3154_v54 }
 0x24c   :  { %2523 = vmatprep.subr.bf16.mxu0 %v3011_v12  ;;  %2538 = vmatprep.subr.bf16.mxu1 %v2802_v45 }
 0x311   :  { %v796_v61 = vpop.f32.mrb[4].mxu0  ;;  %v867_v31 = vpop.f32.mrb[14].mxu1 }
 0x312   :  { %v2688_v32 = vadd.f32 %v796_v61, %v3190_v11  ;;  %v798_v33 = vpop.f32.mrb[5].mxu0  ;;  %v2250_v34 = vpop.f32.mrb[15].mxu1  ;;  %v885_v47 = vadd.f32 %v3207_v36, %v867_v31 }
 0x313   :  { %v2689_v39 = vadd.f32 %v798_v33, %v3196_v14 }
 0x314   :  { %v1995_v38 = vmul.f32 -1.442695, %v2688_v32 }
 0x315   :  { %v1996_v40 = vmul.f32 -1.442695, %v2689_v39 }
 0x316   :  { %2737 = vpow2.f32 %v1995_v38 }
 0x317   :  { %2739 = vpow2.f32 %v1996_v40 }
 0x320   :  { %v2738_v42 = vpop.eup %2737 }
 0x321   :  { %v879_v43 = vadd.f32 1.0, %v2738_v42  ;;  %v2740_v46 = vpop.eup %2739 }
 0x322   :  { %v880_v53 = vadd.f32 1.0, %v2740_v46 }
 0x323   :  { %2741 = vrcp.f32 %v879_v43 }
 0x32d   :  { %v2742_v49 = vpop.eup %2741 }
 0x32e   :  { %v886_v50 = vmul.f32 %v2742_v49, %v885_v47 }
 0x330   :  { %v887_v52 = vadd.f32 %v886_v50, %v3183_v6 }
 0x332   :  { %2743 = vtanh.f32 %v887_v52 }
 0x333   :  { %2745 = vrcp.f32 %v880_v53 }
 0x33c   :  { %v2744_v55 = vpop.eup %2743 }
 0x33d   :  { %v889_v57 = vsub.f32 %v720_v30, %v2744_v55  ;;  %v2746_v58 = vpop.eup %2745 }
 0x33f   :  { %v890_v59 = vmul.f32 %v2746_v58, %v889_v57 }
 0x341   :  { %v891_v60 = vadd.f32 %v2744_v55, %v890_v59 }
 0x343   :  { %1997 = vmatmul.mubr.msk.f32.vlgmr.msra.gmra.mrb[6].mxu0 %vm384_vm1, %v891_v60  ;;  %2268 = vmatmul.mubr.msk.f32.vlgmr.msra.gmra.mrb[16].mxu1 %vm384_vm1, %v891_v60 }
 0x344   :  { %2525 = vmatpush1.bf16.msra.mxu0 %v3028_v19  ;;  %2540 = vmatpush3.bf16.msra.mxu1 %v3114_v44 }
 0x345   :  { %2527 = vmatprep.subr.bf16.mxu0 %v3034_v21  ;;  %2541 = vmatprep.subr.bf16.mxu1 %v2802_v45 }
 0x346   :  { %1136 = vmatprep.mubr.f32.mxu0 %v2801_v3  ;;  %2286 = vmatprep.mubr.msk.f32.mxu1 %vm2803_vm0, %v2801_v3 }
 0x348   :  { %2529 = vmatpush1.bf16.msra.mxu0 %v3052_v27  ;;  %2543 = vmatpush3.bf16.msra.mxu1 %v3128_v48 }
 0x349   :  { %2531 = vmatprep.subr.bf16.mxu0 %v3058_v29  ;;  %2544 = vmatprep.subr.bf16.mxu1 %v2802_v45 }
 0x34c   :  { %2533 = vmatpush1.bf16.msra.mxu0 %v3079_v35  ;;  %2546 = vmatpush3.bf16.msra.mxu1 %v3143_v51 }
 0x34d   :  { %2535 = vmatprep.subr.bf16.mxu0 %v3085_v37  ;;  %2547 = vmatprep.subr.bf16.mxu1 %v2802_v45 }
 0x350   :  { %2537 = vmatpush1.bf16.msra.mxu0 %v3100_v41  ;;  %2549 = vmatpush3.bf16.msra.mxu1 %v3154_v54 }
 0x351   :  { %2551 = vmatprep.subr.bf16.mxu0 %v3011_v12  ;;  %2566 = vmatprep.subr.bf16.mxu1 %v2802_v45 }
 0x416   :  { %v967_v6 = vpop.f32.mrb[6].mxu0  ;;  %v1038_v62 = vpop.f32.mrb[16].mxu1 }
 0x417   :  { %v2690_v63 = vadd.f32 %v967_v6, %v3190_v11  ;;  %v969_v0 = vpop.f32.mrb[7].mxu0  ;;  %v2269_v1 = vpop.f32.mrb[17].mxu1  ;;  %v1056_v22 = vadd.f32 %v3207_v36, %v1038_v62 }
 0x418   :  { %v2691_v8 = vadd.f32 %v969_v0, %v3196_v14 }
 0x419   :  { %v1999_v4 = vmul.f32 -1.442695, %v2690_v63 }
 0x41a   :  { %v2000_v10 = vmul.f32 -1.442695, %v2691_v8 }
 0x41b   :  { %2747 = vpow2.f32 %v1999_v4 }
 0x41c   :  { %2749 = vpow2.f32 %v2000_v10 }
 0x425   :  { %v2748_v15 = vpop.eup %2747 }
 0x426   :  { %v1050_v17 = vadd.f32 1.0, %v2748_v15  ;;  %v2750_v18 = vpop.eup %2749 }
 0x427   :  { %v1051_v26 = vadd.f32 1.0, %v2750_v18 }
 0x428   :  { %2751 = vrcp.f32 %v1050_v17 }
 0x432   :  { %v2752_v23 = vpop.eup %2751 }
 0x433   :  { %v1057_v24 = vmul.f32 %v2752_v23, %v1056_v22 }
 0x435   :  { %v1058_v25 = vadd.f32 %v1057_v24, %v3180_v2 }
 0x437   :  { %2753 = vtanh.f32 %v1058_v25 }
 0x438   :  { %2755 = vrcp.f32 %v1051_v26 }
 0x441   :  { %v2754_v28 = vpop.eup %2753 }
 0x442   :  { %v1060_v30 = vsub.f32 %v891_v60, %v2754_v28  ;;  %v2756_v61 = vpop.eup %2755 }
 0x444   :  { %v1061_v31 = vmul.f32 %v2756_v61, %v1060_v30 }
 0x446   :  { %v1062_v32 = vadd.f32 %v2754_v28, %v1061_v31 }
 0x448   :  { %2001 = vmatmul.mubr.msk.f32.vlgmr.msra.gmra.mrb[8].mxu0 %vm384_vm1, %v1062_v32  ;;  %2287 = vmatmul.mubr.msk.f32.vlgmr.msra.gmra.mrb[18].mxu1 %vm384_vm1, %v1062_v32 }
 0x449   :  { %2553 = vmatpush1.bf16.msra.mxu0 %v3028_v19  ;;  %2568 = vmatpush3.bf16.msra.mxu1 %v3114_v44 }
 0x44a   :  { %2555 = vmatprep.subr.bf16.mxu0 %v3034_v21  ;;  %2569 = vmatprep.subr.bf16.mxu1 %v2802_v45 }
 0x44b   :  { %1307 = vmatprep.mubr.f32.mxu0 %v2801_v3  ;;  %2305 = vmatprep.mubr.msk.f32.mxu1 %vm2803_vm0, %v2801_v3 }
 0x44d   :  { %2557 = vmatpush1.bf16.msra.mxu0 %v3052_v27  ;;  %2571 = vmatpush3.bf16.msra.mxu1 %v3128_v48 }
 0x44e   :  { %2559 = vmatprep.subr.bf16.mxu0 %v3058_v29  ;;  %2572 = vmatprep.subr.bf16.mxu1 %v2802_v45 }
 0x451   :  { %2561 = vmatpush1.bf16.msra.mxu0 %v3079_v35  ;;  %2574 = vmatpush3.bf16.msra.mxu1 %v3143_v51 }
 0x452   :  { %2563 = vmatprep.subr.bf16.mxu0 %v3085_v37  ;;  %2575 = vmatprep.subr.bf16.mxu1 %v2802_v45 }
 0x455   :  { %2565 = vmatpush1.bf16.msra.mxu0 %v3100_v41  ;;  %2577 = vmatpush3.bf16.msra.mxu1 %v3154_v54 }
 0x456   :  { %2579 = vmatprep.subr.bf16.mxu0 %v3011_v12  ;;  %2594 = vmatprep.subr.bf16.mxu1 %v2802_v45 }
 0x51b   :  { %v1138_v2 = vpop.f32.mrb[8].mxu0  ;;  %v1209_v33 = vpop.f32.mrb[18].mxu1 }
 0x51c   :  { %v2692_v34 = vadd.f32 %v1138_v2, %v3190_v11  ;;  %v1140_v38 = vpop.f32.mrb[9].mxu0  ;;  %v2288_v39 = vpop.f32.mrb[19].mxu1  ;;  %v1227_v50 = vadd.f32 %v3207_v36, %v1209_v33 }
 0x51d   :  { %v2693_v42 = vadd.f32 %v1140_v38, %v3196_v14 }
 0x51e   :  { %v2003_v40 = vmul.f32 -1.442695, %v2692_v34 }
 0x51f   :  { %v2004_v43 = vmul.f32 -1.442695, %v2693_v42 }
 0x520   :  { %2757 = vpow2.f32 %v2003_v40 }
 0x521   :  { %2759 = vpow2.f32 %v2004_v43 }
 0x52a   :  { %v2758_v46 = vpop.eup %2757 }
 0x52b   :  { %v1221_v47 = vadd.f32 1.0, %v2758_v46  ;;  %v2760_v49 = vpop.eup %2759  ;;  %v1750_v46 = vld [vmem:[%s3533_s5 + $0x18] sm:$0xff] }
 0x52c   :  { %v1222_v57 = vadd.f32 1.0, %v2760_v49  ;;  %v1747_v49 = vld [vmem:[%s3533_s5] sm:$0xff] }
 0x52d   :  { %2761 = vrcp.f32 %v1221_v47 }
 0x537   :  { %v2762_v52 = vpop.eup %2761 }
 0x538   :  { %v1228_v53 = vmul.f32 %v2762_v52, %v1227_v50  ;;  %v1749_v50 = vld [vmem:[%s3533_s5 + $0x10] sm:$0xff] }
 0x539   :  { %v2636_v52 = vpack.c.bf16 %v1749_v50, %v1747_v49  ;;  %v1879_v49 = vld [vmem:[%s3534_s7 + $0xe0] sm:$0xff]  ;;  %v1880_v50 = vld [vmem:[%s3534_s7 + $0xe8] sm:$0xff] }
 0x53a   :  { %v1229_v55 = vadd.f32 %v1228_v53, %v3192_v13  ;;  %v1754_v53 = vld [vmem:[%s3533_s5 + $0x38] sm:$0xff] }
 0x53c   :  { %2763 = vtanh.f32 %v1229_v55  ;;  %v1751_v55 = vld [vmem:[%s3533_s5 + $0x20] sm:$0xff] }
 0x53d   :  { %2765 = vrcp.f32 %v1222_v57 }
 0x546   :  { %v2764_v58 = vpop.eup %2763 }
 0x547   :  { %v1231_v59 = vsub.f32 %v1062_v32, %v2764_v58  ;;  %v2766_v60 = vpop.eup %2765 }
 0x549   :  { %v1232_v6 = vmul.f32 %v2766_v60, %v1231_v59  ;;  %v1756_v59 = vld [vmem:[%s3533_s5 + $0x48] sm:$0xff]  ;;  %v1758_v60 = vld [vmem:[%s3533_s5 + $0x58] sm:$0xff] }
 0x54b   :  { %v1233_v62 = vadd.f32 %v2764_v58, %v1232_v6  ;;  %v1753_v58 = vld [vmem:[%s3533_s5 + $0x30] sm:$0xff] }
 0x54c   :  { %v2640_v6 = vpack.c.bf16 %v1753_v58, %v1751_v55 }
 0x54d   :  { %2005 = vmatmul.mubr.msk.f32.vlgmr.msra.gmra.mrb[10].mxu0 %vm384_vm1, %v1233_v62  ;;  %2306 = vmatmul.mubr.msk.f32.vlgmr.msra.gmra.mrb[20].mxu1 %vm384_vm1, %v1233_v62 }
 0x54e   :  { %2581 = vmatpush1.bf16.msra.mxu0 %v3028_v19  ;;  %2596 = vmatpush3.bf16.msra.mxu1 %v3114_v44 }
 0x54f   :  { %2583 = vmatprep.subr.bf16.mxu0 %v3034_v21  ;;  %2597 = vmatprep.subr.bf16.mxu1 %v2802_v45 }
 0x550   :  { %1478 = vmatprep.mubr.f32.mxu0 %v2801_v3  ;;  %2324 = vmatprep.mubr.msk.f32.mxu1 %vm2803_vm0, %v2801_v3 }
 0x552   :  { %2585 = vmatpush1.bf16.msra.mxu0 %v3052_v27  ;;  %2599 = vmatpush3.bf16.msra.mxu1 %v3128_v48 }
 0x553   :  { %2587 = vmatprep.subr.bf16.mxu0 %v3058_v29  ;;  %2600 = vmatprep.subr.bf16.mxu1 %v2802_v45 }
 0x556   :  { %2589 = vmatpush1.bf16.msra.mxu0 %v3079_v35  ;;  %2602 = vmatpush3.bf16.msra.mxu1 %v3143_v51 }
 0x557   :  { %2591 = vmatprep.subr.bf16.mxu0 %v3085_v37  ;;  %2603 = vmatprep.subr.bf16.mxu1 %v2802_v45 }
 0x55a   :  { %2593 = vmatpush1.bf16.msra.mxu0 %v3100_v41  ;;  %2605 = vmatpush3.bf16.msra.mxu1 %v3154_v54 }
 0x55b   :  { %2607 = vmatprep.subr.bf16.mxu0 %v3011_v12  ;;  %2622 = vmatprep.subr.bf16.mxu1 %v2802_v45 }
 0x620   :  { %v1309_v13 = vpop.f32.mrb[10].mxu0  ;;  %v1380_v63 = vpop.f32.mrb[20].mxu1 }
 0x621   :  { %v2694_v0 = vadd.f32 %v1309_v13, %v3190_v11  ;;  %v1311_v1 = vpop.f32.mrb[11].mxu0  ;;  %v2307_v4 = vpop.f32.mrb[21].mxu1  ;;  %v1398_v12 = vadd.f32 %v3207_v36, %v1380_v63  ;;  %v1755_v13 = vld [vmem:[%s3533_s5 + $0x40] sm:$0xff]  ;;  %v1757_v63 = vld [vmem:[%s3533_s5 + $0x50] sm:$0xff] }
 0x622   :  { %v2695_v10 = vadd.f32 %v1311_v1, %v3196_v14  ;;  %v1762_v1 = vld [vmem:[%s3533_s5 + $0x78] sm:$0xff]  ;;  %v2644_v4 = vpack.c.bf16 %v1757_v63, %v1755_v13 }
 0x623   :  { %v2007_v8 = vmul.f32 -1.442695, %v2694_v0  ;;  %v1760_v0 = vld [vmem:[%s3533_s5 + $0x68] sm:$0xff] }
 0x624   :  { %v2008_v15 = vmul.f32 -1.442695, %v2695_v10  ;;  %v1759_v10 = vld [vmem:[%s3533_s5 + $0x60] sm:$0xff] }
 0x625   :  { %2767 = vpow2.f32 %v2007_v8  ;;  %v2646_v8 = vpack.c.bf16 %v1762_v1, %v1760_v0 }
 0x626   :  { %2769 = vpow2.f32 %v2008_v15  ;;  %v1761_v15 = vld [vmem:[%s3533_s5 + $0x70] sm:$0xff] }
 0x62f   :  { %v2768_v17 = vpop.eup %2767 }
 0x630   :  { %v1392_v18 = vadd.f32 1.0, %v2768_v17  ;;  %v2770_v22 = vpop.eup %2769  ;;  %v2648_v17 = vpack.c.bf16 %v1761_v15, %v1759_v10 }
 0x631   :  { %v1393_v26 = vadd.f32 1.0, %v2770_v22  ;;  %v1868_v22 = vld [vmem:[%s3534_s7 + $0x88] sm:$0xff] }
 0x632   :  { %2771 = vrcp.f32 %v1392_v18  ;;  %v1867_v18 = vld [vmem:[%s3534_s7 + $0x80] sm:$0xff] }
 0x63c   :  { %v2772_v23 = vpop.eup %2771 }
 0x63d   :  { %v1399_v24 = vmul.f32 %v2772_v23, %v1398_v12  ;;  %v1851_v12 = vld [vmem:[%s3534_s7] sm:$0xff]  ;;  %v2650_v23 = vpack.c.bf16 %v1868_v22, %v1867_v18 }
 0x63f   :  { %v1400_v25 = vadd.f32 %v1399_v24, %v3186_v9  ;;  %v1852_v24 = vld [vmem:[%s3534_s7 + $0x8] sm:$0xff] }
 0x641   :  { %2773 = vtanh.f32 %v1400_v25  ;;  %v1869_v25 = vld [vmem:[%s3534_s7 + $0x90] sm:$0xff] }
 0x642   :  { %2775 = vrcp.f32 %v1393_v26  ;;  %v1870_v26 = vld [vmem:[%s3534_s7 + $0x98] sm:$0xff] }
 0x64b   :  { %v2774_v28 = vpop.eup %2773 }
 0x64c   :  { %v1402_v30 = vsub.f32 %v1233_v62, %v2774_v28  ;;  %v2776_v61 = vpop.eup %2775  ;;  %v2642_v62 = vpack.c.bf16 %v1758_v60, %v1756_v59 }
 0x64e   :  { %v1403_v31 = vmul.f32 %v2776_v61, %v1402_v30  ;;  %v2654_v30 = vpack.c.bf16 %v1870_v26, %v1869_v25  ;;  %v1853_v61 = vld [vmem:[%s3534_s7 + $0x10] sm:$0xff]  ;;  %v1866_v26 = vld [vmem:[%s3534_s7 + $0x78] sm:$0xff] }
 0x64f   :  { %v1865_v25 = vld [vmem:[%s3534_s7 + $0x70] sm:$0xff] }
 0x650   :  { %v1404_v32 = vadd.f32 %v2774_v28, %v1403_v31  ;;  %v2652_v28 = vpack.c.bf16 %v1852_v24, %v1851_v12  ;;  %v1854_v31 = vld [vmem:[%s3534_s7 + $0x18] sm:$0xff]  ;;  %v1863_v12 = vld [vmem:[%s3534_s7 + $0x60] sm:$0xff] }
 0x652   :  { %2009 = vmatmul.mubr.msk.f32.vlgmr.msra.gmra.mrb[12].mxu0 %vm384_vm1, %v1404_v32  ;;  %2325 = vmatmul.mubr.msk.f32.vlgmr.msra.gmra.mrb[22].mxu1 %vm384_vm1, %v1404_v32 }
 0x653   :  { %2609 = vmatpush1.bf16.msra.mxu0 %v3028_v19  ;;  %2624 = vmatpush3.bf16.msra.mxu1 %v3114_v44 }
 0x654   :  { %2611 = vmatprep.subr.bf16.mxu0 %v3034_v21  ;;  %2625 = vmatprep.subr.bf16.mxu1 %v2802_v45 }
 0x655   :  { %1649 = vmatprep.mubr.f32.mxu0 %v2801_v3  ;;  %2343 = vmatprep.mubr.msk.f32.mxu1 %vm2803_vm0, %v2801_v3 }
 0x657   :  { %2613 = vmatpush1.bf16.msra.mxu0 %v3052_v27  ;;  %2627 = vmatpush3.bf16.msra.mxu1 %v3128_v48 }
 0x658   :  { %2615 = vmatprep.subr.bf16.mxu0 %v3058_v29  ;;  %2628 = vmatprep.subr.bf16.mxu1 %v2802_v45 }
 0x65b   :  { %2617 = vmatpush1.bf16.msra.mxu0 %v3079_v35  ;;  %2630 = vmatpush3.bf16.msra.mxu1 %v3143_v51 }
 0x65c   :  { %2619 = vmatprep.subr.bf16.mxu0 %v3085_v37  ;;  %2631 = vmatprep.subr.bf16.mxu1 %v2802_v45 }
 0x65f   :  { %2621 = vmatpush1.bf16.msra.mxu0 %v3100_v41  ;;  %2633 = vmatpush3.bf16.msra.mxu1 %v3154_v54 }
 0x660   :  { %2651 = vmatprep.subr.bf16.mxu0 %v2650_v23  ;;  %v1881_v23 = vld [vmem:[%s3534_s7 + $0xf0] sm:$0xff] }
 0x725   :  { %v1480_v19 = vpop.f32.mrb[12].mxu0  ;;  %v1551_v21 = vpop.f32.mrb[22].mxu1 }
 0x726   :  { %v2696_v27 = vadd.f32 %v1480_v19, %v3190_v11  ;;  %v1482_v44 = vpop.f32.mrb[13].mxu0  ;;  %v2326_v29 = vpop.f32.mrb[23].mxu1  ;;  %v1569_v41 = vadd.f32 %v3207_v36, %v1551_v21  ;;  %v1872_v19 = vld [vmem:[%s3534_s7 + $0xa8] sm:$0xff]  ;;  %v2656_v21 = vpack.c.bf16 %v1854_v31, %v1853_v61 }
 0x727   :  { %v2697_v35 = vadd.f32 %v1482_v44, %v3196_v14  ;;  %v1855_v44 = vld [vmem:[%s3534_s7 + $0x20] sm:$0xff]  ;;  %v1856_v29 = vld [vmem:[%s3534_s7 + $0x28] sm:$0xff] }
 0x728   :  { %v2011_v48 = vmul.f32 -1.442695, %v2696_v27 }
 0x729   :  { %v2012_v9 = vmul.f32 -1.442695, %v2697_v35  ;;  %v1874_v35 = vld [vmem:[%s3534_s7 + $0xb8] sm:$0xff] }
 0x72a   :  { %2777 = vpow2.f32 %v2011_v48  ;;  %v1873_v48 = vld [vmem:[%s3534_s7 + $0xb0] sm:$0xff] }
 0x72b   :  { %2779 = vpow2.f32 %v2012_v9  ;;  %v2660_v9 = vpack.c.bf16 %v1856_v29, %v1855_v44 }
 0x734   :  { %v2778_v51 = vpop.eup %2777 }
 0x735   :  { %v1563_v2 = vadd.f32 1.0, %v2778_v51  ;;  %v2780_v37 = vpop.eup %2779  ;;  %v2662_v51 = vpack.c.bf16 %v1874_v35, %v1873_v48  ;;  %v2018_v35 = vld [vmem:[%s3536_s8] ss:$0 sm:$0xff] }
 0x736   :  { %v1564_v34 = vadd.f32 1.0, %v2780_v37  ;;  %v1858_v37 = vld [vmem:[%s3534_s7 + $0x38] sm:$0xff] }
 0x737   :  { %2781 = vrcp.f32 %v1563_v2  ;;  %v1857_v2 = vld [vmem:[%s3534_s7 + $0x30] sm:$0xff] }
 0x741   :  { %v2782_v45 = vpop.eup %2781 }
 0x742   :  { %v1570_v54 = vmul.f32 %v2782_v45, %v1569_v41  ;;  %v1875_v41 = vld [vmem:[%s3534_s7 + $0xc0] sm:$0xff]  ;;  %v1876_v45 = vld [vmem:[%s3534_s7 + $0xc8] sm:$0xff] }
 0x744   :  { %v1571_v33 = vadd.f32 %v1570_v54, %v3201_v20  ;;  %v1748_v20 = vld [vmem:[%s3533_s5 + $0x8] sm:$0xff]  ;;  %v2664_v54 = vpack.c.bf16 %v1858_v37, %v1857_v2 }
 0x745   :  { %v2634_v47 = vpack.c.bf16 %v1750_v46, %v1748_v20  ;;  %v1861_v46 = vld [vmem:[%s3534_s7 + $0x50] sm:$0xff] }
 0x746   :  { %2783 = vtanh.f32 %v1571_v33  ;;  %v2666_v33 = vpack.c.bf16 %v1876_v45, %v1875_v41 }
 0x747   :  { %2785 = vrcp.f32 %v1564_v34  ;;  %2635 = vmatprep.subr.bf16.mxu1 %v2634_v47  ;;  %v1859_v34 = vld [vmem:[%s3534_s7 + $0x40] sm:$0xff]  ;;  %v1862_v47 = vld [vmem:[%s3534_s7 + $0x58] sm:$0xff] }
 0x750   :  { %v2784_v38 = vpop.eup %2783 }
 0x751   :  { %v1573_v39 = vsub.f32 %v1404_v32, %v2784_v38  ;;  %v2786_v40 = vpop.eup %2785  ;;  %v1871_v32 = vld [vmem:[%s3534_s7 + $0xa0] sm:$0xff] }
 0x752   :  { %v2658_v27 = vpack.c.bf16 %v1872_v19, %v1871_v32 }
 0x753   :  { %v1574_v42 = vmul.f32 %v2786_v40, %v1573_v39  ;;  %v1877_v39 = vld [vmem:[%s3534_s7 + $0xd0] sm:$0xff]  ;;  %v1878_v40 = vld [vmem:[%s3534_s7 + $0xd8] sm:$0xff] }
 0x754   :  { %v2670_v20 = vpack.c.bf16 %v1878_v40, %v1877_v39 }
 0x755   :  { %v3358_v43 = vadd.f32 %v2784_v38, %v1574_v42  ;;  %v1860_v38 = vld [vmem:[%s3534_s7 + $0x48] sm:$0xff] }
 0x756   :  { %v2668_v42 = vpack.c.bf16 %v1860_v38, %v1859_v34 }
 0x757   :  { %2013 = vmatmul.mubr.msk.f32.vlgmr.msra.gmra.mrb[14].mxu0 %vm384_vm1, %v3358_v43  ;;  %2344 = vmatmul.mubr.msk.f32.vlgmr.msra.gmra.mrb[24].mxu1 %vm384_vm1, %v3358_v43 }
 0x758   :  { %1842 = vmatprep.mubr.f32.mxu1 %v2801_v3  ;;  %v1752_v3 = vld [vmem:[%s3533_s5 + $0x28] sm:$0xff]  ;;  %2637 = vmatpush1.bf16.msra.mxu1 %v2636_v52  ;;  %v2672_v52 = vpack.c.bf16 %v1862_v47, %v1861_v46 }
 0x759   :  { %v2638_v57 = vpack.c.bf16 %v1754_v53, %v1752_v3  ;;  %2653 = vmatpush3.bf16.msra.mxu0 %v2652_v28  ;;  %v2674_v3 = vpack.c.bf16 %v1880_v50, %v1879_v49  ;;  %v2680_v28 = vpack.c.bf16 %v1866_v26, %v1865_v25 }
 0x75a   :  { %2655 = vmatprep.subr.bf16.mxu0 %v2654_v30  ;;  %v1763_v30 = vld [vmem:[%s3535_s6] sm:$0x3] }
 0x75b   :  { %2639 = vmatprep.subr.bf16.mxu1 %v2638_v57  ;;  %v1768_v61 = vrot.slane %v1763_v30, %v92_v5  ;;  %v1772_v31 = vrot.slane %v1763_v30, %v96_v7 }
 0x75c   :  { %2641 = vmatpush1.bf16.msra.mxu1 %v2640_v6 }
 0x75d   :  { %2643 = vmatprep.subr.bf16.mxu1 %v2642_v62  ;;  %2657 = vmatpush3.bf16.msra.mxu0 %v2656_v21 }
 0x75e   :  { %2659 = vmatprep.subr.bf16.mxu0 %v2658_v27 }
 0x760   :  { %2645 = vmatpush1.bf16.msra.mxu1 %v2644_v4 }
 0x761   :  { %2647 = vmatprep.subr.bf16.mxu1 %v2646_v8  ;;  %2661 = vmatpush3.bf16.msra.mxu0 %v2660_v9 }
 0x762   :  { %2663 = vmatprep.subr.bf16.mxu0 %v2662_v51 }
 0x764   :  { %2649 = vmatpush1.bf16.msra.mxu1 %v2648_v17 }
 0x765   :  { %2665 = vmatpush3.bf16.msra.mxu0 %v2664_v54 }
 0x766   :  { %2667 = vmatprep.subr.bf16.mxu0 %v2666_v33 }
 0x769   :  { %2669 = vmatpush3.bf16.msra.mxu0 %v2668_v42 }
 0x76a   :  { %2671 = vmatprep.subr.bf16.mxu0 %v2670_v20 }
 0x76d   :  { %2673 = vmatpush3.bf16.msra.mxu0 %v2672_v52 }
 0x76e   :  { %2675 = vmatprep.subr.bf16.mxu0 %v2674_v3 }
 0x82a   :  { %v1651_v53 = vpop.f32.mrb[14].mxu0  ;;  %v1722_v55 = vpop.f32.mrb[24].mxu1 }
 0x82b   :  { %v2698_v57 = vadd.f32 %v1651_v53, %v3190_v11  ;;  %v1653_v58 = vpop.f32.mrb[15].mxu0  ;;  %v2345_v59 = vpop.f32.mrb[25].mxu1  ;;  %v1740_v1 = vadd.f32 %v3207_v36, %v1722_v55  ;;  %v1864_v36 = vld [vmem:[%s3534_s7 + $0x68] sm:$0xff] }
 0x82c   :  { %v2699_v6 = vadd.f32 %v1653_v58, %v3196_v14 }
 0x82d   :  { %v2015_v60 = vmul.f32 -1.442695, %v2698_v57 }
 0x82e   :  { %v2016_v62 = vmul.f32 -1.442695, %v2699_v6 }
 0x82f   :  { %2787 = vpow2.f32 %v2015_v60 }
 0x830   :  { %2789 = vpow2.f32 %v2016_v62 }
 0x839   :  { %v2788_v13 = vpop.eup %2787 }
 0x83a   :  { %v1734_v63 = vadd.f32 1.0, %v2788_v13  ;;  %v2790_v0 = vpop.eup %2789 }
 0x83b   :  { %v1735_v15 = vadd.f32 1.0, %v2790_v0 }
 0x83c   :  { %2791 = vrcp.f32 %v1734_v63 }
 0x846   :  { %v2792_v4 = vpop.eup %2791 }
 0x847   :  { %v1741_v8 = vmul.f32 %v2792_v4, %v1740_v1 }
 0x849   :  { %v1742_v10 = vadd.f32 %v1741_v8, %v3198_v16  ;;  %v2676_v16 = vpack.c.bf16 %v1864_v36, %v1863_v12 }
 0x84b   :  { %2793 = vtanh.f32 %v1742_v10  ;;  %2677 = vmatpush3.bf16.msra.mxu0 %v2676_v16 }
 0x84c   :  { %2795 = vrcp.f32 %v1735_v15 }
 0x855   :  { %v2794_v11 = vpop.eup %2793 }
 0x856   :  { %v1744_v17 = vsub.f32 %v3358_v43, %v2794_v11  ;;  %v2796_v18 = vpop.eup %2795  ;;  %v1882_v43 = vld [vmem:[%s3534_s7 + $0xf8] sm:$0xff] }
 0x857   :  { %v2678_v24 = vpack.c.bf16 %v1882_v43, %v1881_v23 }
 0x858   :  { %v1745_v14 = vmul.f32 %v2796_v18, %v1744_v17 }
 0x859   :  { %2679 = vmatprep.subr.bf16.mxu0 %v2678_v24 }
 0x85a   :  { %v1746_v22 = vadd.f32 %v2794_v11, %v1745_v14  ;;  %2681 = vmatpush3.bf16.msra.mxu0 %v2680_v28 }
 0x85c   :  { %2017 = vmatmul.mubr.msk.f32.vlgmr.msra.gmra.mrb[26].mxu1 %vm384_vm1, %v1746_v22 }
 0x92f   :  { %v1844_v32 = vpop.f32.mrb[26].mxu1 }
 0x930   :  { %v1845_v19 = vadd.f32 %v1844_v32, %v1768_v61  ;;  %v1846_v21 = vpop.f32.mrb[27].mxu1 }
 0x931   :  { %v1847_v27 = vadd.f32 %v1846_v21, %v1772_v31 }
 0x932   :  { %v1849_v29 = vmax.f32 %v1845_v19, 0.0 }
 0x933   :  { %v1850_v44 = vmax.f32 %v1847_v27, 0.0 }
 0x935   :  { %1954 = vmatprep.mubr.f32.mxu0 %v1850_v44 }
 0x936   :  { %1955 = vmatmul.mubr.f32.vlgmr.msra.gmra.mrb[16].mxu0 %v1849_v29 }
 0xa09   :  { %v2147_v48 = vpop.f32.mrb[16].mxu0 }
 0xa0a   :  { %v2148_v9 = vpop.f32.mrb[17].mxu0 }
 0xa0b   :  { %v2149_v51 = vadd.f32 %v2148_v9, %v2147_v48 }
 0xa0d   :  { %v1957_v5 = vadd.f32 %v2149_v51, %v2018_v35 }
 0xa0f   :  { %v1961_v2 = vsel %vm1960_vm2, %v1957_v5, -inf }
 0xa10   :  { %1962 = vmax.xlane.f32.xlu0 %v1961_v2 }
 0xa9d   :  { %v1963_v56 = vpop.xlane.xlu0 %1962 }
 0xa9e   :  { %v1964_v7 = vsub.f32 %v1957_v5, %v1963_v56 }
 0xaa0   :  { %v1965_v37 = vmul.f32 1.442695, %v1964_v7 }
 0xaa2   :  { %2797 = vpow2.f32 %v1965_v37 }
 0xaac   :  { %v2798_v41 = vpop.eup %2797 }
 0xaad   :  { %v1967_v45 = vsel %vm1960_vm2, %v2798_v41, 0.0 }
 0xaae   :  { %1968 = vadd.xlane.f32.xlu0 %v1967_v45 }
 0xb3b   :  { %v1969_v54 = vpop.xlane.xlu0 %1968 }
 0xb3c   :  { %2799 = vlog2.f32 %v1969_v54 }
 0xb46   :  { %v2800_v33 = vpop.eup %2799 }
 0xb47   :  { %v1971_v34 = vmul.f32 0.6931472, %v2800_v33 }
 0xb49   :  { %v1972_v38 = vadd.f32 %v1971_v34, %v1963_v56 }
 0xb4b   :  { %v1973_v39 = vsub.f32 %v1957_v5, %v1972_v38 }
 0xb4d   :  { %1974 = vst [vmem:[%s3537_s9] sm:$0xff] %v1973_v39 }

</bundles_post_ra>
